<compile_context>
chip_gen: v7x
topology: tpu7x:2x2x1
jax: 0.10.0
libtpu: 0.0.40
codegen_flags: <defaults>
</compile_context>

<pallas_src>
import math

import numpy as np

import jax
import jax.numpy as jnp
from jax.experimental import pallas as pl
from jax.experimental.pallas import tpu as pltpu


# --------------------------- pooling as matmuls ----------------------------- #

def _pool_selection_matrices(H, W):
    """Four (H//2*W//2, H*W) 0/1 matrices selecting the 4 corners of each 2x2
    window (rows ordered h*W + w). maxpool2x2 == elementwise max of S_k @ z.
    Exact in f32 (rows have a single 1.0), so no extra rounding vs. jnp.max."""
    H2, W2 = H // 2, W // 2
    out_idx = np.arange(H2 * W2)
    h2, w2 = out_idx // W2, out_idx % W2
    mats = []
    for dh in (0, 1):
        for dw in (0, 1):
            src = (2 * h2 + dh) * W + (2 * w2 + dw)
            m = np.zeros((H2 * W2, H * W), np.float32)
            m[out_idx, src] = 1.0
            mats.append(m)
    return mats


# ------------------------------ fused kernel -------------------------------- #

def _make_fused_kernel(n_stages):
    """Whole-forward kernel. Ref order:
    x, [wc, bc, wr, br, S00, S01, S10, S11] * n_stages, wf, bf, out."""

    def kernel(*refs):
        x_ref, o_ref = refs[0], refs[-1]

        def conv_relu(z, w_ref, b_ref):
            y = jnp.dot(z, w_ref[...], preferred_element_type=jnp.float32)
            return jnp.maximum(y + b_ref[...], 0.0)

        def maxpool(z, sel_refs):
            c = [jnp.dot(s[...], z, preferred_element_type=jnp.float32)
                 for s in sel_refs]
            return jnp.maximum(jnp.maximum(c[0], c[1]),
                               jnp.maximum(c[2], c[3]))

        z = x_ref[...]                                   # (H*W, Cin) for one n
        pos = 1
        for _ in range(n_stages):
            wc_ref, bc_ref, wr_ref, br_ref = refs[pos:pos + 4]
            sel_refs = refs[pos + 4:pos + 8]
            pos += 8
            z = conv_relu(z, wc_ref, bc_ref)   # fused parallel branches (1x1)
            z = conv_relu(z, wr_ref, br_ref)   # Conv2d(c, 2c, 1) + ReLU
            z = maxpool(z, sel_refs)           # MaxPool2d(2, stride=2)
        wf_ref, bf_ref = refs[pos], refs[pos + 1]
        o_ref[...] = conv_relu(z, wf_ref, bf_ref).astype(o_ref.dtype)

    return kernel


# ------------------------------ params & wrapper ----------------------------- #

def init_params(key, in_chans, n_reductions=2, n_branches=2, filter_size=8):
    """Deterministic PyTorch-style uniform(-1/sqrt(fan_in), 1/sqrt(fan_in)) init."""
    def conv_init(k, cin, cout):
        kw, kb = jax.random.split(k)
        bound = 1.0 / math.sqrt(cin)    # 1x1 conv: fan_in = cin
        w = jax.random.uniform(kw, (cin, cout), jnp.float32, -bound, bound)
        b = jax.random.uniform(kb, (cout,), jnp.float32, -bound, bound)
        return w, b

    params = {"stages": [], "final": None}
    chans = in_chans
    for _ in range(n_reductions):
        key, *ks = jax.random.split(key, n_branches + 2)
        branches = [conv_init(ks[j], chans, filter_size)
                    for j in range(n_branches)]
        concat_chans = n_branches * filter_size
        reduce_wb = conv_init(ks[-1], concat_chans, 2 * concat_chans)
        params["stages"].append({"branches": branches, "reduce": reduce_wb})
        chans = 2 * concat_chans
    _, kf = jax.random.split(key)
    params["final"] = conv_init(kf, chans, 1)
    return params


def wide_ae_forward(x_nchw, params):
    N, C, H, W = x_nchw.shape
    n_stages = len(params["stages"])

    # NCHW -> (N, H*W, C): channels on lanes, pixels on sublanes.
    x = jnp.transpose(x_nchw, (0, 2, 3, 1)).reshape(N, H * W, C)

    operands = [x]
    in_specs = [pl.BlockSpec((None, H * W, C), lambda n: (n, 0, 0))]

    def full2d_spec(arr):
        return pl.BlockSpec(arr.shape, lambda n: (0, 0))

    flops = 0
    h, w, c = H, W, C
    for stage in params["stages"]:
        # Fuse the parallel branches: concat weights along Cout once, outside
        # the kernel (tiny, one-time) -> single wide matmul inside the kernel.
        wc = jnp.concatenate([wb for wb, _ in stage["branches"]], axis=1)
        bc = jnp.concatenate([bb for _, bb in stage["branches"]],
                             axis=0).reshape(1, -1)
        wr, br = stage["reduce"]
        br = br.reshape(1, -1)
        sels = [jnp.asarray(s) for s in _pool_selection_matrices(h, w)]
        for arr in (wc, bc, wr, br, *sels):
            operands.append(arr)
            in_specs.append(full2d_spec(arr))
        p = h * w
        flops += 2 * N * (p * c * wc.shape[1]
                          + p * wc.shape[1] * wr.shape[1]
                          + 4 * (h // 2) * (w // 2) * p * wr.shape[1])
        h, w, c = h // 2, w // 2, wr.shape[1]

    wf, bf = params["final"]
    bf = bf.reshape(1, -1)
    for arr in (wf, bf):
        operands.append(arr)
        in_specs.append(full2d_spec(arr))
    flops += 2 * N * (h * w) * c * wf.shape[1]

    out_rows = h * w
    bytes_accessed = int(sum(np.prod(a.shape) for a in operands) * 4
                         + N * out_rows * 4)

    out = pl.pallas_call(
        _make_fused_kernel(n_stages),
        out_shape=jax.ShapeDtypeStruct((N, out_rows, 1), x.dtype),
        grid=(N,),
        in_specs=in_specs,
        out_specs=pl.BlockSpec((None, out_rows, 1), lambda n: (n, 0, 0)),
        compiler_params=pltpu.CompilerParams(
            dimension_semantics=("parallel",)),   # v7x: 2 TCs split the batch
        cost_estimate=pl.CostEstimate(flops=flops, transcendentals=0,
                                      bytes_accessed=bytes_accessed),
    )(*operands)

    # (N, H/4*W/4, 1) -> NCHW
    return jnp.transpose(out.reshape(N, h, w, 1), (0, 3, 1, 2))


# --------------------------- pure-JAX reference ------------------------------ #

def _ref_conv1x1_relu(x, w, b):
    y = jnp.einsum("nchw,cd->ndhw", x, w) + b[None, :, None, None]
    return jnp.maximum(y, 0.0)


def _ref_maxpool(x):
    N, C, H, W = x.shape
    return x.reshape(N, C, H // 2, 2, W // 2, 2).max(axis=(3, 5))


def wide_ae_reference(x, params):
    for stage in params["stages"]:
        branches = [_ref_conv1x1_relu(x, w, b) for (w, b) in stage["branches"]]
        x = jnp.concatenate(branches, axis=1)
        x = _ref_conv1x1_relu(x, *stage["reduce"])
        x = _ref_maxpool(x)
    return _ref_conv1x1_relu(x, *params["final"])


# ---------------------------------- main ------------------------------------- #

if __name__ == "__main__":
    key = jax.random.PRNGKey(0)
    kx, kp = jax.random.split(key)
    N, C, H, W = 2, 4, 16, 16
    x = jax.random.uniform(kx, (N, C, H, W), jnp.float32)
    params = init_params(kp, C, n_reductions=2, n_branches=2, filter_size=8)

    out = jax.block_until_ready(wide_ae_forward(x, params))
    ref = wide_ae_reference(x, params)

    assert out.shape == (N, 1, H // 4, W // 4), out.shape
    assert jnp.allclose(out, ref, atol=1e-5, rtol=1e-5), "mismatch vs reference"
    print("KERNEL_OK")
</pallas_src>

<mosaic_0001>
module attributes {stable_mosaic.version = 11 : i64} {
  func.func @kernel(%arg0: i32, %arg1: memref<1x256x4xf32, #tpu.memory_space<vmem>>, %arg2: memref<4x16xf32, #tpu.memory_space<vmem>>, %arg3: memref<1x16xf32, #tpu.memory_space<vmem>>, %arg4: memref<16x32xf32, #tpu.memory_space<vmem>>, %arg5: memref<1x32xf32, #tpu.memory_space<vmem>>, %arg6: memref<64x256xf32, #tpu.memory_space<vmem>>, %arg7: memref<64x256xf32, #tpu.memory_space<vmem>>, %arg8: memref<64x256xf32, #tpu.memory_space<vmem>>, %arg9: memref<64x256xf32, #tpu.memory_space<vmem>>, %arg10: memref<32x16xf32, #tpu.memory_space<vmem>>, %arg11: memref<1x16xf32, #tpu.memory_space<vmem>>, %arg12: memref<16x32xf32, #tpu.memory_space<vmem>>, %arg13: memref<1x32xf32, #tpu.memory_space<vmem>>, %arg14: memref<16x64xf32, #tpu.memory_space<vmem>>, %arg15: memref<16x64xf32, #tpu.memory_space<vmem>>, %arg16: memref<16x64xf32, #tpu.memory_space<vmem>>, %arg17: memref<16x64xf32, #tpu.memory_space<vmem>>, %arg18: memref<32x1xf32, #tpu.memory_space<vmem>>, %arg19: memref<1x1xf32, #tpu.memory_space<vmem>>, %arg20: memref<1x16x1xf32, #tpu.memory_space<vmem>>) attributes {dimension_semantics = [#tpu.dimension_semantics<parallel>], iteration_bounds = array<i64: 2>, scalar_prefetch = 0 : i64, scratch_operands = 0 : i64, tpu.core_type = #tpu.core_type<tc>, window_params = [{transform_indices = @transform_0, window_bounds = array<i64: 1, 256, 4>}, {pipeline_mode = #tpu.pipeline_mode<synchronous>, transform_indices = @transform_1, window_bounds = array<i64: 4, 16>}, {pipeline_mode = #tpu.pipeline_mode<synchronous>, transform_indices = @transform_2, window_bounds = array<i64: 1, 16>}, {pipeline_mode = #tpu.pipeline_mode<synchronous>, transform_indices = @transform_3, window_bounds = array<i64: 16, 32>}, {pipeline_mode = #tpu.pipeline_mode<synchronous>, transform_indices = @transform_4, window_bounds = array<i64: 1, 32>}, {pipeline_mode = #tpu.pipeline_mode<synchronous>, transform_indices = @transform_5, window_bounds = array<i64: 64, 256>}, {pipeline_mode = #tpu.pipeline_mode<synchronous>, transform_indices = @transform_6, window_bounds = array<i64: 64, 256>}, {pipeline_mode = #tpu.pipeline_mode<synchronous>, transform_indices = @transform_7, window_bounds = array<i64: 64, 256>}, {pipeline_mode = #tpu.pipeline_mode<synchronous>, transform_indices = @transform_8, window_bounds = array<i64: 64, 256>}, {pipeline_mode = #tpu.pipeline_mode<synchronous>, transform_indices = @transform_9, window_bounds = array<i64: 32, 16>}, {pipeline_mode = #tpu.pipeline_mode<synchronous>, transform_indices = @transform_10, window_bounds = array<i64: 1, 16>}, {pipeline_mode = #tpu.pipeline_mode<synchronous>, transform_indices = @transform_11, window_bounds = array<i64: 16, 32>}, {pipeline_mode = #tpu.pipeline_mode<synchronous>, transform_indices = @transform_12, window_bounds = array<i64: 1, 32>}, {pipeline_mode = #tpu.pipeline_mode<synchronous>, transform_indices = @transform_13, window_bounds = array<i64: 16, 64>}, {pipeline_mode = #tpu.pipeline_mode<synchronous>, transform_indices = @transform_14, window_bounds = array<i64: 16, 64>}, {pipeline_mode = #tpu.pipeline_mode<synchronous>, transform_indices = @transform_15, window_bounds = array<i64: 16, 64>}, {pipeline_mode = #tpu.pipeline_mode<synchronous>, transform_indices = @transform_16, window_bounds = array<i64: 16, 64>}, {pipeline_mode = #tpu.pipeline_mode<synchronous>, transform_indices = @transform_17, window_bounds = array<i64: 32, 1>}, {pipeline_mode = #tpu.pipeline_mode<synchronous>, transform_indices = @transform_18, window_bounds = array<i64: 1, 1>}, {transform_indices = @transform_19, window_bounds = array<i64: 1, 16, 1>}]} {
    %c0 = arith.constant 0 : index
    %c0_0 = arith.constant 0 : index
    %c0_1 = arith.constant 0 : index
    %0 = vector.load %arg1[%c0, %c0_0, %c0_1] : memref<1x256x4xf32, #tpu.memory_space<vmem>>, vector<1x256x4xf32>
    %1 = vector.shape_cast %0 : vector<1x256x4xf32> to vector<256x4xf32>
    %c0_2 = arith.constant 0 : index
    %c0_3 = arith.constant 0 : index
    %2 = vector.load %arg2[%c0_2, %c0_3] : memref<4x16xf32, #tpu.memory_space<vmem>>, vector<4x16xf32>
    %cst = arith.constant dense<0.000000e+00> : vector<256x16xf32>
    %3 = tpu.matmul %1, %2, %cst {dimension_numbers = #tpu.dot_dimension_numbers<[1], [0], [0], [1], [0, 0, 1, 1], [], []>} : vector<256x4xf32>, vector<4x16xf32>, vector<256x16xf32> -> vector<256x16xf32>
    %c0_4 = arith.constant 0 : index
    %c0_5 = arith.constant 0 : index
    %4 = vector.load %arg3[%c0_4, %c0_5] : memref<1x16xf32, #tpu.memory_space<vmem>>, vector<1x16xf32>
    %5 = vector.broadcast %4 : vector<1x16xf32> to vector<256x16xf32>
    %6 = arith.addf %3, %5 : vector<256x16xf32>
    %cst_6 = arith.constant 0.000000e+00 : f32
    %7 = vector.broadcast %cst_6 : f32 to vector<256x16xf32>
    %8 = arith.maximumf %6, %7 : vector<256x16xf32>
    %c0_7 = arith.constant 0 : index
    %c0_8 = arith.constant 0 : index
    %9 = vector.load %arg4[%c0_7, %c0_8] : memref<16x32xf32, #tpu.memory_space<vmem>>, vector<16x32xf32>
    %cst_9 = arith.constant dense<0.000000e+00> : vector<256x32xf32>
    %10 = tpu.matmul %8, %9, %cst_9 {dimension_numbers = #tpu.dot_dimension_numbers<[1], [0], [0], [1], [0, 0, 1, 1], [], []>} : vector<256x16xf32>, vector<16x32xf32>, vector<256x32xf32> -> vector<256x32xf32>
    %c0_10 = arith.constant 0 : index
    %c0_11 = arith.constant 0 : index
    %11 = vector.load %arg5[%c0_10, %c0_11] : memref<1x32xf32, #tpu.memory_space<vmem>>, vector<1x32xf32>
    %12 = vector.broadcast %11 : vector<1x32xf32> to vector<256x32xf32>
    %13 = arith.addf %10, %12 : vector<256x32xf32>
    %cst_12 = arith.constant 0.000000e+00 : f32
    %14 = vector.broadcast %cst_12 : f32 to vector<256x32xf32>
    %15 = arith.maximumf %13, %14 : vector<256x32xf32>
    %c0_13 = arith.constant 0 : index
    %c0_14 = arith.constant 0 : index
    %16 = vector.load %arg6[%c0_13, %c0_14] : memref<64x256xf32, #tpu.memory_space<vmem>>, vector<64x256xf32>
    %cst_15 = arith.constant dense<0.000000e+00> : vector<64x32xf32>
    %17 = tpu.matmul %16, %15, %cst_15 {dimension_numbers = #tpu.dot_dimension_numbers<[1], [0], [0], [1], [0, 0, 1, 1], [], []>} : vector<64x256xf32>, vector<256x32xf32>, vector<64x32xf32> -> vector<64x32xf32>
    %c0_16 = arith.constant 0 : index
    %c0_17 = arith.constant 0 : index
    %18 = vector.load %arg7[%c0_16, %c0_17] : memref<64x256xf32, #tpu.memory_space<vmem>>, vector<64x256xf32>
    %cst_18 = arith.constant dense<0.000000e+00> : vector<64x32xf32>
    %19 = tpu.matmul %18, %15, %cst_18 {dimension_numbers = #tpu.dot_dimension_numbers<[1], [0], [0], [1], [0, 0, 1, 1], [], []>} : vector<64x256xf32>, vector<256x32xf32>, vector<64x32xf32> -> vector<64x32xf32>
    %c0_19 = arith.constant 0 : index
    %c0_20 = arith.constant 0 : index
    %20 = vector.load %arg8[%c0_19, %c0_20] : memref<64x256xf32, #tpu.memory_space<vmem>>, vector<64x256xf32>
    %cst_21 = arith.constant dense<0.000000e+00> : vector<64x32xf32>
    %21 = tpu.matmul %20, %15, %cst_21 {dimension_numbers = #tpu.dot_dimension_numbers<[1], [0], [0], [1], [0, 0, 1, 1], [], []>} : vector<64x256xf32>, vector<256x32xf32>, vector<64x32xf32> -> vector<64x32xf32>
    %c0_22 = arith.constant 0 : index
    %c0_23 = arith.constant 0 : index
    %22 = vector.load %arg9[%c0_22, %c0_23] : memref<64x256xf32, #tpu.memory_space<vmem>>, vector<64x256xf32>
    %cst_24 = arith.constant dense<0.000000e+00> : vector<64x32xf32>
    %23 = tpu.matmul %22, %15, %cst_24 {dimension_numbers = #tpu.dot_dimension_numbers<[1], [0], [0], [1], [0, 0, 1, 1], [], []>} : vector<64x256xf32>, vector<256x32xf32>, vector<64x32xf32> -> vector<64x32xf32>
    %24 = arith.maximumf %17, %19 : vector<64x32xf32>
    %25 = arith.maximumf %21, %23 : vector<64x32xf32>
    %26 = arith.maximumf %24, %25 : vector<64x32xf32>
    %c0_25 = arith.constant 0 : index
    %c0_26 = arith.constant 0 : index
    %27 = vector.load %arg10[%c0_25, %c0_26] : memref<32x16xf32, #tpu.memory_space<vmem>>, vector<32x16xf32>
    %cst_27 = arith.constant dense<0.000000e+00> : vector<64x16xf32>
    %28 = tpu.matmul %26, %27, %cst_27 {dimension_numbers = #tpu.dot_dimension_numbers<[1], [0], [0], [1], [0, 0, 1, 1], [], []>} : vector<64x32xf32>, vector<32x16xf32>, vector<64x16xf32> -> vector<64x16xf32>
    %c0_28 = arith.constant 0 : index
    %c0_29 = arith.constant 0 : index
    %29 = vector.load %arg11[%c0_28, %c0_29] : memref<1x16xf32, #tpu.memory_space<vmem>>, vector<1x16xf32>
    %30 = vector.broadcast %29 : vector<1x16xf32> to vector<64x16xf32>
    %31 = arith.addf %28, %30 : vector<64x16xf32>
    %cst_30 = arith.constant 0.000000e+00 : f32
    %32 = vector.broadcast %cst_30 : f32 to vector<64x16xf32>
    %33 = arith.maximumf %31, %32 : vector<64x16xf32>
    %c0_31 = arith.constant 0 : index
    %c0_32 = arith.constant 0 : index
    %34 = vector.load %arg12[%c0_31, %c0_32] : memref<16x32xf32, #tpu.memory_space<vmem>>, vector<16x32xf32>
    %cst_33 = arith.constant dense<0.000000e+00> : vector<64x32xf32>
    %35 = tpu.matmul %33, %34, %cst_33 {dimension_numbers = #tpu.dot_dimension_numbers<[1], [0], [0], [1], [0, 0, 1, 1], [], []>} : vector<64x16xf32>, vector<16x32xf32>, vector<64x32xf32> -> vector<64x32xf32>
    %c0_34 = arith.constant 0 : index
    %c0_35 = arith.constant 0 : index
    %36 = vector.load %arg13[%c0_34, %c0_35] : memref<1x32xf32, #tpu.memory_space<vmem>>, vector<1x32xf32>
    %37 = vector.broadcast %36 : vector<1x32xf32> to vector<64x32xf32>
    %38 = arith.addf %35, %37 : vector<64x32xf32>
    %cst_36 = arith.constant 0.000000e+00 : f32
    %39 = vector.broadcast %cst_36 : f32 to vector<64x32xf32>
    %40 = arith.maximumf %38, %39 : vector<64x32xf32>
    %c0_37 = arith.constant 0 : index
    %c0_38 = arith.constant 0 : index
    %41 = vector.load %arg14[%c0_37, %c0_38] : memref<16x64xf32, #tpu.memory_space<vmem>>, vector<16x64xf32>
    %cst_39 = arith.constant dense<0.000000e+00> : vector<16x32xf32>
    %42 = tpu.matmul %41, %40, %cst_39 {dimension_numbers = #tpu.dot_dimension_numbers<[1], [0], [0], [1], [0, 0, 1, 1], [], []>} : vector<16x64xf32>, vector<64x32xf32>, vector<16x32xf32> -> vector<16x32xf32>
    %c0_40 = arith.constant 0 : index
    %c0_41 = arith.constant 0 : index
    %43 = vector.load %arg15[%c0_40, %c0_41] : memref<16x64xf32, #tpu.memory_space<vmem>>, vector<16x64xf32>
    %cst_42 = arith.constant dense<0.000000e+00> : vector<16x32xf32>
    %44 = tpu.matmul %43, %40, %cst_42 {dimension_numbers = #tpu.dot_dimension_numbers<[1], [0], [0], [1], [0, 0, 1, 1], [], []>} : vector<16x64xf32>, vector<64x32xf32>, vector<16x32xf32> -> vector<16x32xf32>
    %c0_43 = arith.constant 0 : index
    %c0_44 = arith.constant 0 : index
    %45 = vector.load %arg16[%c0_43, %c0_44] : memref<16x64xf32, #tpu.memory_space<vmem>>, vector<16x64xf32>
    %cst_45 = arith.constant dense<0.000000e+00> : vector<16x32xf32>
    %46 = tpu.matmul %45, %40, %cst_45 {dimension_numbers = #tpu.dot_dimension_numbers<[1], [0], [0], [1], [0, 0, 1, 1], [], []>} : vector<16x64xf32>, vector<64x32xf32>, vector<16x32xf32> -> vector<16x32xf32>
    %c0_46 = arith.constant 0 : index
    %c0_47 = arith.constant 0 : index
    %47 = vector.load %arg17[%c0_46, %c0_47] : memref<16x64xf32, #tpu.memory_space<vmem>>, vector<16x64xf32>
    %cst_48 = arith.constant dense<0.000000e+00> : vector<16x32xf32>
    %48 = tpu.matmul %47, %40, %cst_48 {dimension_numbers = #tpu.dot_dimension_numbers<[1], [0], [0], [1], [0, 0, 1, 1], [], []>} : vector<16x64xf32>, vector<64x32xf32>, vector<16x32xf32> -> vector<16x32xf32>
    %49 = arith.maximumf %42, %44 : vector<16x32xf32>
    %50 = arith.maximumf %46, %48 : vector<16x32xf32>
    %51 = arith.maximumf %49, %50 : vector<16x32xf32>
    %c0_49 = arith.constant 0 : index
    %c0_50 = arith.constant 0 : index
    %52 = vector.load %arg18[%c0_49, %c0_50] : memref<32x1xf32, #tpu.memory_space<vmem>>, vector<32x1xf32>
    %cst_51 = arith.constant dense<0.000000e+00> : vector<16x1xf32>
    %53 = tpu.matmul %51, %52, %cst_51 {dimension_numbers = #tpu.dot_dimension_numbers<[1], [0], [0], [1], [0, 0, 1, 1], [], []>} : vector<16x32xf32>, vector<32x1xf32>, vector<16x1xf32> -> vector<16x1xf32>
    %c0_52 = arith.constant 0 : index
    %c0_53 = arith.constant 0 : index
    %54 = vector.load %arg19[%c0_52, %c0_53] : memref<1x1xf32, #tpu.memory_space<vmem>>, vector<1x1xf32>
    %55 = vector.broadcast %54 : vector<1x1xf32> to vector<16x1xf32>
    %56 = arith.addf %53, %55 : vector<16x1xf32>
    %cst_54 = arith.constant 0.000000e+00 : f32
    %57 = vector.broadcast %cst_54 : f32 to vector<16x1xf32>
    %58 = arith.maximumf %56, %57 : vector<16x1xf32>
    %c0_55 = arith.constant 0 : index
    %c0_56 = arith.constant 0 : index
    %c0_57 = arith.constant 0 : index
    %59 = vector.load %arg20[%c0_55, %c0_56, %c0_57] : memref<1x16x1xf32, #tpu.memory_space<vmem>>, vector<1x16x1xf32>
    %60 = vector.shape_cast %59 : vector<1x16x1xf32> to vector<16x1xf32>
    %61 = vector.shape_cast %58 : vector<16x1xf32> to vector<1x16x1xf32>
    tpu.vector_store %arg20[%c0_55, %c0_56, %c0_57], %61 {strides = array<i32>} : memref<1x16x1xf32, #tpu.memory_space<vmem>>, vector<1x16x1xf32>,
    return
  }
  func.func @transform_0(%arg0: i32) -> (i32, i32, i32) {
    %c0_i32 = arith.constant 0 : i32
    %c0_i32_0 = arith.constant 0 : i32
    %c0_i32_1 = arith.constant 0 : i32
    return %arg0, %c0_i32, %c0_i32_0 : i32, i32, i32
  }
  func.func @transform_1(%arg0: i32) -> (i32, i32) {
    %c0_i32 = arith.constant 0 : i32
    %c0_i32_0 = arith.constant 0 : i32
    %c0_i32_1 = arith.constant 0 : i32
    return %c0_i32, %c0_i32_0 : i32, i32
  }
  func.func @transform_2(%arg0: i32) -> (i32, i32) {
    %c0_i32 = arith.constant 0 : i32
    %c0_i32_0 = arith.constant 0 : i32
    %c0_i32_1 = arith.constant 0 : i32
    return %c0_i32, %c0_i32_0 : i32, i32
  }
  func.func @transform_3(%arg0: i32) -> (i32, i32) {
    %c0_i32 = arith.constant 0 : i32
    %c0_i32_0 = arith.constant 0 : i32
    %c0_i32_1 = arith.constant 0 : i32
    return %c0_i32, %c0_i32_0 : i32, i32
  }
  func.func @transform_4(%arg0: i32) -> (i32, i32) {
    %c0_i32 = arith.constant 0 : i32
    %c0_i32_0 = arith.constant 0 : i32
    %c0_i32_1 = arith.constant 0 : i32
    return %c0_i32, %c0_i32_0 : i32, i32
  }
  func.func @transform_5(%arg0: i32) -> (i32, i32) {
    %c0_i32 = arith.constant 0 : i32
    %c0_i32_0 = arith.constant 0 : i32
    %c0_i32_1 = arith.constant 0 : i32
    return %c0_i32, %c0_i32_0 : i32, i32
  }
  func.func @transform_6(%arg0: i32) -> (i32, i32) {
    %c0_i32 = arith.constant 0 : i32
    %c0_i32_0 = arith.constant 0 : i32
    %c0_i32_1 = arith.constant 0 : i32
    return %c0_i32, %c0_i32_0 : i32, i32
  }
  func.func @transform_7(%arg0: i32) -> (i32, i32) {
    %c0_i32 = arith.constant 0 : i32
    %c0_i32_0 = arith.constant 0 : i32
    %c0_i32_1 = arith.constant 0 : i32
    return %c0_i32, %c0_i32_0 : i32, i32
  }
  func.func @transform_8(%arg0: i32) -> (i32, i32) {
    %c0_i32 = arith.constant 0 : i32
    %c0_i32_0 = arith.constant 0 : i32
    %c0_i32_1 = arith.constant 0 : i32
    return %c0_i32, %c0_i32_0 : i32, i32
  }
  func.func @transform_9(%arg0: i32) -> (i32, i32) {
    %c0_i32 = arith.constant 0 : i32
    %c0_i32_0 = arith.constant 0 : i32
    %c0_i32_1 = arith.constant 0 : i32
    return %c0_i32, %c0_i32_0 : i32, i32
  }
  func.func @transform_10(%arg0: i32) -> (i32, i32) {
    %c0_i32 = arith.constant 0 : i32
    %c0_i32_0 = arith.constant 0 : i32
    %c0_i32_1 = arith.constant 0 : i32
    return %c0_i32, %c0_i32_0 : i32, i32
  }
  func.func @transform_11(%arg0: i32) -> (i32, i32) {
    %c0_i32 = arith.constant 0 : i32
    %c0_i32_0 = arith.constant 0 : i32
    %c0_i32_1 = arith.constant 0 : i32
    return %c0_i32, %c0_i32_0 : i32, i32
  }
  func.func @transform_12(%arg0: i32) -> (i32, i32) {
    %c0_i32 = arith.constant 0 : i32
    %c0_i32_0 = arith.constant 0 : i32
    %c0_i32_1 = arith.constant 0 : i32
    return %c0_i32, %c0_i32_0 : i32, i32
  }
  func.func @transform_13(%arg0: i32) -> (i32, i32) {
    %c0_i32 = arith.constant 0 : i32
    %c0_i32_0 = arith.constant 0 : i32
    %c0_i32_1 = arith.constant 0 : i32
    return %c0_i32, %c0_i32_0 : i32, i32
  }
  func.func @transform_14(%arg0: i32) -> (i32, i32) {
    %c0_i32 = arith.constant 0 : i32
    %c0_i32_0 = arith.constant 0 : i32
    %c0_i32_1 = arith.constant 0 : i32
    return %c0_i32, %c0_i32_0 : i32, i32
  }
  func.func @transform_15(%arg0: i32) -> (i32, i32) {
    %c0_i32 = arith.constant 0 : i32
    %c0_i32_0 = arith.constant 0 : i32
    %c0_i32_1 = arith.constant 0 : i32
    return %c0_i32, %c0_i32_0 : i32, i32
  }
  func.func @transform_16(%arg0: i32) -> (i32, i32) {
    %c0_i32 = arith.constant 0 : i32
    %c0_i32_0 = arith.constant 0 : i32
    %c0_i32_1 = arith.constant 0 : i32
    return %c0_i32, %c0_i32_0 : i32, i32
  }
  func.func @transform_17(%arg0: i32) -> (i32, i32) {
    %c0_i32 = arith.constant 0 : i32
    %c0_i32_0 = arith.constant 0 : i32
    %c0_i32_1 = arith.constant 0 : i32
    return %c0_i32, %c0_i32_0 : i32, i32
  }
  func.func @transform_18(%arg0: i32) -> (i32, i32) {
    %c0_i32 = arith.constant 0 : i32
    %c0_i32_0 = arith.constant 0 : i32
    %c0_i32_1 = arith.constant 0 : i32
    return %c0_i32, %c0_i32_0 : i32, i32
  }
  func.func @transform_19(%arg0: i32) -> (i32, i32, i32) {
    %c0_i32 = arith.constant 0 : i32
    %c0_i32_0 = arith.constant 0 : i32
    %c0_i32_1 = arith.constant 0 : i32
    return %arg0, %c0_i32, %c0_i32_0 : i32, i32, i32
  }
}

</mosaic_0001>

<bundles_post_ra>
// kernel: tpu_custom_call.1
= control target key start
LH: loop header
LB: loop body
LE: loop exit
PB: predicated region body
PF: predicated region fallthrough
CT: control target
= control target key end

     0   :  { %s3690_s20 = smov 0   ;;  %s4341_s0 = inlined_call_operand.vmem [shape: f32[2,256,4], index: 0, kind: input, shape index: {}]   ;;  %s4342_s1 = inlined_call_operand.vmem [shape: f32[4,16], index: 1, kind: input, shape index: {}]   ;;  %s4343_s2 = inlined_call_operand.vmem [shape: f32[1,16], index: 2, kind: input, shape index: {}]   ;;  %s4344_s3 = inlined_call_operand.vmem [shape: f32[16,32], index: 3, kind: input, shape index: {}]   ;;  %s4345_s4 = inlined_call_operand.vmem [shape: f32[1,32], index: 4, kind: input, shape index: {}]   ;;  %s4346_s5 = inlined_call_operand.vmem [shape: f32[64,256], index: 5, kind: input, shape index: {}]   ;;  %s4347_s6 = inlined_call_operand.vmem [shape: f32[64,256], index: 6, kind: input, shape index: {}]   ;;  %s4348_s7 = inlined_call_operand.vmem [shape: f32[64,256], index: 7, kind: input, shape index: {}]   ;;  %s4349_s8 = inlined_call_operand.vmem [shape: f32[64,256], index: 8, kind: input, shape index: {}]   ;;  %s4350_s9 = inlined_call_operand.vmem [shape: f32[32,16], index: 9, kind: input, shape index: {}]   ;;  %s4351_s10 = inlined_call_operand.vmem [shape: f32[1,16], index: 10, kind: input, shape index: {}]   ;;  %s4352_s11 = inlined_call_operand.vmem [shape: f32[16,32], index: 11, kind: input, shape index: {}]   ;;  %s4353_s12 = inlined_call_operand.vmem [shape: f32[1,32], index: 12, kind: input, shape index: {}]   ;;  %s4354_s13 = inlined_call_operand.vmem [shape: f32[16,64], index: 13, kind: input, shape index: {}]   ;;  %s4355_s14 = inlined_call_operand.vmem [shape: f32[16,64], index: 14, kind: input, shape index: {}]   ;;  %s4356_s15 = inlined_call_operand.vmem [shape: f32[16,64], index: 15, kind: input, shape index: {}]   ;;  %s4357_s16 = inlined_call_operand.vmem [shape: f32[16,64], index: 16, kind: input, shape index: {}]   ;;  %s4358_s17 = inlined_call_operand.vmem [shape: f32[32,1], index: 17, kind: input, shape index: {}]   ;;  %s4359_s18 = inlined_call_operand.<no memory space> [shape: f32[1,1], index: 18, kind: input, shape index: {}]   ;;  %s4360_s19 = inlined_call_operand.vmem [shape: f32[2,16,1], index: 19, kind: output, shape index: {}]  }
   0x1   :  { %4362 = sst [smem:[#allocation3_spill]] %s4341_s0  ;;  %v24_v0 = vstv %s4359_s18 }
   0x2   :  { %4363 = sst [smem:[#allocation4_spill]] %s4342_s1  ;;  %25 = vst [vmem:[#allocation2] sm:$0x1] %v24_v0 }
   0x3   :  { %4364 = sst [smem:[#allocation5_spill]] %s4343_s2 }
   0x4   :  { %4365 = sst [smem:[#allocation6_spill]] %s4344_s3 }
   0x5 LB: > { %s2660_s21 = sadd.s32 4294967295, %s3585_s20   ;;  %p2664_p0 = scmp.ge.s32.totalorder %s3585_s20, 1  ;;  %s3585_s20 = sphi %s3690_s20, %s31_s20  }
   0x6   : > { %p539_p1 = scmp.lt.s32.totalorder %s3585_s20, 3 }
   0x8   : > { %p540_p2 = pnand %p2664_p0, %p539_p1 }
   0x9   : > { %s4366_s2 = sld [smem:[#allocation4_spill]] (!%p540_p2)  ;;  %vm742_vm0 = vcmask (!%p540_p2), 1043456   ;;  %p595_p3 = scmp.lt.s32.totalorder (!%p540_p2), %s2660_s21, 1  ;;  %vm645_vm1 = vcmask (!%p540_p2), 31744   ;;  %vm1012_vm2 = vcmask (!%p540_p2), 130048   ;;  %vm1885_vm3 = vcmask (!%p540_p2), 261120  }
   0xa   : > { %543 = sbr.rel (%p540_p2) target bundleno = 1695 (0x69f), region = 96  ;;  %s4367_s25 = sld [smem:[#allocation3_spill]] (!%p540_p2)  ;;  %vm2171_vm4 = vcmask (!%p540_p2), 523264   ;;  %vm2602_vm5 = vcmask (!%p540_p2), 7168  }
   0xb   : > { %s4368_s28 = sld [smem:[#allocation6_spill]] (!%p540_p2)  ;;  %s4369_s22 = sld [smem:[#allocation5_spill]] (!%p540_p2) }
   0xf   : > { %v637_v1 = vld [vmem:[%s4366_s2] sm:$0xf] (!%p540_p2) }
  0x10   : > { %3128 = vmatprep.subr.msk.mxu0 (!%p540_p2), %vm742_vm0, %v637_v1  ;;  %3569 = vmatprep.subr.msk.mxu1 (!%p540_p2), %vm742_vm0, %v637_v1 }
  0x11   : > { %3129 = vmatpush3.msk.msra.mxu0 %vm742_vm0, %v637_v1  ;;  %s4371_s21 = smov (!%p595_p3, %s2660_s21), 1  ;;  %3570 = vmatpush3.msk.msra.mxu1 %vm742_vm0, %v637_v1  ;;  %v1003_v34 = vld [vmem:[%s4368_s28] sm:$0xff]  ;;  %v1004_v35 = vld [vmem:[%s4368_s28 + $0x8] sm:$0xff] }
  0x12   : > { %s2767_s18 = sshll.u32 %s4371_s21, 8  ;;  %v3353_v36 = vpack.c.bf16 %v1004_v35, %v1003_v34  ;;  %v3782_v37 = vld [vmem:[%s4369_s22] ss:$0 sm:$0xff] }
  0x13   : > { %s3707_s3 = scalar_lea.vmem %s4367_s25, %s2767_s18  ;;  %s2768_s18 = sshll.u32 %s4371_s21, 4 }
  0x14   : > { %v605_v2 = vld [vmem:[%s3707_s3] sm:$0xff]  ;;  %v606_v3 = vld [vmem:[%s3707_s3 + $0x8] sm:$0xff]  ;;  %v607_v4 = vld [vmem:[%s3707_s3 + $0x10] sm:$0xff]  ;;  %3354 = vmatprep.subr.bf16.mxu1 %v3353_v36  ;;  %s604_s25 = scalar_lea.vmem %s4360_s19, %s2768_s18 }
  0x15   : > { %3130 = vmatprep.mubr.msk.f32.mxu0 %vm645_vm1, %v605_v2  ;;  %v608_v5 = vld [vmem:[%s3707_s3 + $0x18] sm:$0xff]  ;;  %v609_v6 = vld [vmem:[%s3707_s3 + $0x20] sm:$0xff]  ;;  %v610_v7 = vld [vmem:[%s3707_s3 + $0x28] sm:$0xff] }
  0x16   : > { %3131 = vmatmul.mubr.msk.f32.vlgmr.msra.gmra.mrb[0].mxu0 %vm645_vm1, %v606_v3  ;;  %v611_v8 = vld [vmem:[%s3707_s3 + $0x30] sm:$0xff]  ;;  %v636_v10 = vld [vmem:[%s3707_s3 + $0xf8] sm:$0xff]  ;;  %v613_v12 = vld [vmem:[%s3707_s3 + $0x40] sm:$0xff] }
  0x17   : > { %3133 = vmatprep.mubr.msk.f32.mxu0 %vm645_vm1, %v607_v4  ;;  %v635_v9 = vld [vmem:[%s3707_s3 + $0xf0] sm:$0xff]  ;;  %v612_v11 = vld [vmem:[%s3707_s3 + $0x38] sm:$0xff]  ;;  %v614_v13 = vld [vmem:[%s3707_s3 + $0x48] sm:$0xff] }
  0x18   : > { %3175 = vmatprep.mubr.msk.f32.mxu1 %vm645_vm1, %v635_v9  ;;  %v615_v14 = vld [vmem:[%s3707_s3 + $0x50] sm:$0xff]  ;;  %v616_v15 = vld [vmem:[%s3707_s3 + $0x58] sm:$0xff]  ;;  %v617_v16 = vld [vmem:[%s3707_s3 + $0x60] sm:$0xff] }
  0x19   : > { %3176 = vmatmul.mubr.msk.f32.vlgmr.msra.gmra.mrb[0].mxu1 %vm645_vm1, %v636_v10  ;;  %v618_v17 = vld [vmem:[%s3707_s3 + $0x68] sm:$0xff]  ;;  %v619_v18 = vld [vmem:[%s3707_s3 + $0x70] sm:$0xff]  ;;  %v620_v19 = vld [vmem:[%s3707_s3 + $0x78] sm:$0xff] }
  0x1a   : > { %3134 = vmatmul.mubr.msk.f32.gmra.mrb[2].mxu0 %vm645_vm1, %v608_v5  ;;  %v621_v20 = vld [vmem:[%s3707_s3 + $0x80] sm:$0xff]  ;;  %v622_v21 = vld [vmem:[%s3707_s3 + $0x88] sm:$0xff]  ;;  %v623_v22 = vld [vmem:[%s3707_s3 + $0x90] sm:$0xff]  ;;  %3356 = vmatpush3.bf16.msra.mxu1 %v3353_v36 }
  0x1b   : > { %3136 = vmatprep.mubr.msk.f32.mxu0 %vm645_vm1, %v609_v6  ;;  %v624_v23 = vld [vmem:[%s3707_s3 + $0x98] sm:$0xff]  ;;  %v625_v24 = vld [vmem:[%s3707_s3 + $0xa0] sm:$0xff]  ;;  %v626_v25 = vld [vmem:[%s3707_s3 + $0xa8] sm:$0xff] }
  0x1c   : > { %v627_v26 = vld [vmem:[%s3707_s3 + $0xb0] sm:$0xff]  ;;  %v628_v27 = vld [vmem:[%s3707_s3 + $0xb8] sm:$0xff]  ;;  %v629_v28 = vld [vmem:[%s3707_s3 + $0xc0] sm:$0xff] }
  0x1d   : > { %v630_v29 = vld [vmem:[%s3707_s3 + $0xc8] sm:$0xff]  ;;  %v631_v30 = vld [vmem:[%s3707_s3 + $0xd0] sm:$0xff]  ;;  %v632_v31 = vld [vmem:[%s3707_s3 + $0xd8] sm:$0xff] }
  0x1e   : > { %3137 = vmatmul.mubr.msk.f32.gmra.mrb[4].mxu0 %vm645_vm1, %v610_v7  ;;  %v633_v32 = vld [vmem:[%s3707_s3 + $0xe0] sm:$0xff]  ;;  %v634_v33 = vld [vmem:[%s3707_s3 + $0xe8] sm:$0xff] }
  0x1f   : > { %3139 = vmatprep.mubr.msk.f32.mxu0 %vm645_vm1, %v611_v8 }
  0x22   : > { %3140 = vmatmul.mubr.msk.f32.gmra.mrb[6].mxu0 %vm645_vm1, %v612_v11 }
  0x23   : > { %3142 = vmatprep.mubr.msk.f32.mxu0 %vm645_vm1, %v613_v12 }
  0x26   : > { %3143 = vmatmul.mubr.msk.f32.gmra.mrb[8].mxu0 %vm645_vm1, %v614_v13 }
  0x27   : > { %3145 = vmatprep.mubr.msk.f32.mxu0 %vm645_vm1, %v615_v14 }
  0x2a   : > { %3146 = vmatmul.mubr.msk.f32.gmra.mrb[10].mxu0 %vm645_vm1, %v616_v15 }
  0x2b   : > { %3148 = vmatprep.mubr.msk.f32.mxu0 %vm645_vm1, %v617_v16 }
  0x2e   : > { %3149 = vmatmul.mubr.msk.f32.gmra.mrb[12].mxu0 %vm645_vm1, %v618_v17 }
  0x2f   : > { %3151 = vmatprep.mubr.msk.f32.mxu0 %vm645_vm1, %v619_v18 }
  0x32   : > { %3152 = vmatmul.mubr.msk.f32.gmra.mrb[14].mxu0 %vm645_vm1, %v620_v19 }
  0x33   : > { %3154 = vmatprep.mubr.msk.f32.mxu0 %vm645_vm1, %v621_v20 }
  0x36   : > { %3155 = vmatmul.mubr.msk.f32.gmra.mrb[16].mxu0 %vm645_vm1, %v622_v21 }
  0x37   : > { %3157 = vmatprep.mubr.msk.f32.mxu0 %vm645_vm1, %v623_v22 }
  0x3a   : > { %3158 = vmatmul.mubr.msk.f32.gmra.mrb[18].mxu0 %vm645_vm1, %v624_v23 }
  0x3b   : > { %3160 = vmatprep.mubr.msk.f32.mxu0 %vm645_vm1, %v625_v24 }
  0x3e   : > { %3161 = vmatmul.mubr.msk.f32.gmra.mrb[20].mxu0 %vm645_vm1, %v626_v25 }
  0x3f   : > { %3163 = vmatprep.mubr.msk.f32.mxu0 %vm645_vm1, %v627_v26 }
  0x42   : > { %3164 = vmatmul.mubr.msk.f32.gmra.mrb[22].mxu0 %vm645_vm1, %v628_v27 }
  0x43   : > { %3166 = vmatprep.mubr.msk.f32.mxu0 %vm645_vm1, %v629_v28 }
  0x46   : > { %3167 = vmatmul.mubr.msk.f32.gmra.mrb[24].mxu0 %vm645_vm1, %v630_v29 }
  0x47   : > { %3169 = vmatprep.mubr.msk.f32.mxu0 %vm645_vm1, %v631_v30 }
  0x4a   : > { %3170 = vmatmul.mubr.msk.f32.gmra.mrb[26].mxu0 %vm645_vm1, %v632_v31 }
  0x4b   : > { %3172 = vmatprep.mubr.msk.f32.mxu0 %vm645_vm1, %v633_v32 }
  0x4e   : > { %3173 = vmatmul.mubr.msk.f32.gmra.mrb[28].mxu0 %vm645_vm1, %v634_v33 }
  0xe9   : > { %v3132_v38 = vpop.f32.mrb[0].mxu0 }
  0xea   : > { %v818_v39 = vadd.f32 %v3132_v38, %v3782_v37  ;;  %v812_v40 = vpop.f32.mrb[1].mxu0 }
  0xeb   : > { %v813_v41 = vadd.f32 %v3782_v37, %v812_v40 }
  0xec   : > { %v972_v44 = vmax.f32 %v818_v39, 0.0  ;;  %v3793_v54 = vpop.f32.mrb[0].mxu1 }
  0xed   : > { %v971_v42 = vmax.f32 %v813_v41, 0.0  ;;  %v3135_v43 = vpop.f32.mrb[2].mxu0  ;;  %v3796_v55 = vpop.f32.mrb[1].mxu1 }
  0xee   : > { %v828_v45 = vadd.f32 %v3135_v43, %v3782_v37  ;;  %v822_v46 = vpop.f32.mrb[3].mxu0 }
  0xef   : > { %v823_v47 = vadd.f32 %v3782_v37, %v822_v46  ;;  %3182 = vmatprep.mubr.msk.f32.mxu1 %vm1012_vm2, %v971_v42 }
  0xf0   : > { %3183 = vmatmul.mubr.msk.f32.vlgmr.msra.gmra.mrb[2].mxu1 %vm1012_vm2, %v972_v44  ;;  %v974_v50 = vmax.f32 %v828_v45, 0.0 }
  0xf1   : > { %v973_v48 = vmax.f32 %v823_v47, 0.0  ;;  %v3138_v49 = vpop.f32.mrb[4].mxu0 }
  0xf2   : > { %v838_v51 = vadd.f32 %v3138_v49, %v3782_v37  ;;  %v832_v52 = vpop.f32.mrb[5].mxu0 }
  0xf3   : > { %v833_v53 = vadd.f32 %v3782_v37, %v832_v52  ;;  %3185 = vmatprep.mubr.msk.f32.mxu1 %vm1012_vm2, %v973_v48 }
  0xf4   : > { %3186 = vmatmul.mubr.msk.f32.gmra.mrb[4].mxu1 %vm1012_vm2, %v974_v50  ;;  %v976_v58 = vmax.f32 %v838_v51, 0.0 }
  0xf5   : > { %v975_v56 = vmax.f32 %v833_v53, 0.0  ;;  %v3141_v57 = vpop.f32.mrb[6].mxu0 }
  0xf6   : > { %v848_v59 = vadd.f32 %v3141_v57, %v3782_v37  ;;  %v842_v60 = vpop.f32.mrb[7].mxu0 }
  0xf7   : > { %v843_v61 = vadd.f32 %v3782_v37, %v842_v60  ;;  %3188 = vmatprep.mubr.msk.f32.mxu1 %vm1012_vm2, %v975_v56 }
  0xf8   : > { %3189 = vmatmul.mubr.msk.f32.gmra.mrb[6].mxu1 %vm1012_vm2, %v976_v58  ;;  %v978_v0 = vmax.f32 %v848_v59, 0.0 }
  0xf9   : > { %v977_v62 = vmax.f32 %v843_v61, 0.0  ;;  %v3144_v63 = vpop.f32.mrb[8].mxu0 }
  0xfa   : > { %v858_v1 = vadd.f32 %v3144_v63, %v3782_v37  ;;  %v852_v2 = vpop.f32.mrb[9].mxu0  ;;  %v963_v63 = vadd.f32 %v3782_v37, %v3796_v55 }
  0xfb   : > { %v853_v3 = vadd.f32 %v3782_v37, %v852_v2  ;;  %3191 = vmatprep.mubr.msk.f32.mxu1 %vm1012_vm2, %v977_v62 }
  0xfc   : > { %3192 = vmatmul.mubr.msk.f32.gmra.mrb[8].mxu1 %vm1012_vm2, %v978_v0  ;;  %v980_v6 = vmax.f32 %v858_v1, 0.0 }
  0xfd   : > { %v979_v4 = vmax.f32 %v853_v3, 0.0  ;;  %v3147_v5 = vpop.f32.mrb[10].mxu0 }
  0xfe   : > { %v868_v7 = vadd.f32 %v3147_v5, %v3782_v37  ;;  %v862_v8 = vpop.f32.mrb[11].mxu0  ;;  %v1001_v5 = vmax.f32 %v963_v63, 0.0 }
  0xff   : > { %v863_v9 = vadd.f32 %v3782_v37, %v862_v8  ;;  %3194 = vmatprep.mubr.msk.f32.mxu1 %vm1012_vm2, %v979_v4  ;;  %v1367_v8 = vld [vmem:[%s4346_s5 + $0x8] sm:$0xff] }
 0x100   : > { %3195 = vmatmul.mubr.msk.f32.gmra.mrb[10].mxu1 %vm1012_vm2, %v980_v6  ;;  %v982_v12 = vmax.f32 %v868_v7, 0.0  ;;  %v968_v7 = vadd.f32 %v3793_v54, %v3782_v37  ;;  %1446 = vmatprep.mubr.f32.mxu0 %v1367_v8 }
 0x101   : > { %v981_v10 = vmax.f32 %v863_v9, 0.0  ;;  %v3150_v11 = vpop.f32.mrb[12].mxu0  ;;  %v1488_v9 = vld [vmem:[%s4347_s6 + $0x8] sm:$0xff] }
 0x102   : > { %v878_v13 = vadd.f32 %v3150_v11, %v3782_v37  ;;  %v872_v14 = vpop.f32.mrb[13].mxu0  ;;  %v1002_v55 = vmax.f32 %v968_v7, 0.0 }
 0x103   : > { %v873_v15 = vadd.f32 %v3782_v37, %v872_v14  ;;  %3197 = vmatprep.mubr.msk.f32.mxu1 %vm1012_vm2, %v981_v10 }
 0x104   : > { %3198 = vmatmul.mubr.msk.f32.gmra.mrb[12].mxu1 %vm1012_vm2, %v982_v12  ;;  %v984_v18 = vmax.f32 %v878_v13, 0.0 }
 0x105   : > { %v983_v16 = vmax.f32 %v873_v15, 0.0  ;;  %v3153_v17 = vpop.f32.mrb[14].mxu0 }
 0x106   : > { %v888_v19 = vadd.f32 %v3153_v17, %v3782_v37  ;;  %v882_v20 = vpop.f32.mrb[15].mxu0 }
 0x107   : > { %v883_v21 = vadd.f32 %v3782_v37, %v882_v20  ;;  %3200 = vmatprep.mubr.msk.f32.mxu1 %vm1012_vm2, %v983_v16 }
 0x108   : > { %3201 = vmatmul.mubr.msk.f32.gmra.mrb[14].mxu1 %vm1012_vm2, %v984_v18  ;;  %v986_v24 = vmax.f32 %v888_v19, 0.0 }
 0x109   : > { %v985_v22 = vmax.f32 %v883_v21, 0.0  ;;  %v3156_v23 = vpop.f32.mrb[16].mxu0 }
 0x10a   : > { %v898_v25 = vadd.f32 %v3156_v23, %v3782_v37  ;;  %v892_v26 = vpop.f32.mrb[17].mxu0 }
 0x10b   : > { %v893_v27 = vadd.f32 %v3782_v37, %v892_v26  ;;  %3203 = vmatprep.mubr.msk.f32.mxu1 %vm1012_vm2, %v985_v22 }
 0x10c   : > { %3204 = vmatmul.mubr.msk.f32.gmra.mrb[16].mxu1 %vm1012_vm2, %v986_v24  ;;  %v988_v30 = vmax.f32 %v898_v25, 0.0 }
 0x10d   : > { %v987_v28 = vmax.f32 %v893_v27, 0.0  ;;  %v3159_v29 = vpop.f32.mrb[18].mxu0 }
 0x10e   : > { %v908_v31 = vadd.f32 %v3159_v29, %v3782_v37  ;;  %v902_v32 = vpop.f32.mrb[19].mxu0 }
 0x10f   : > { %v903_v33 = vadd.f32 %v3782_v37, %v902_v32  ;;  %3206 = vmatprep.mubr.msk.f32.mxu1 %vm1012_vm2, %v987_v28 }
 0x110   : > { %3207 = vmatmul.mubr.msk.f32.gmra.mrb[18].mxu1 %vm1012_vm2, %v988_v30  ;;  %v990_v36 = vmax.f32 %v908_v31, 0.0 }
 0x111   : > { %v989_v34 = vmax.f32 %v903_v33, 0.0  ;;  %v3162_v35 = vpop.f32.mrb[20].mxu0 }
 0x112   : > { %v918_v38 = vadd.f32 %v3162_v35, %v3782_v37  ;;  %v912_v39 = vpop.f32.mrb[21].mxu0 }
 0x113   : > { %v913_v40 = vadd.f32 %v3782_v37, %v912_v39  ;;  %3209 = vmatprep.mubr.msk.f32.mxu1 %vm1012_vm2, %v989_v34 }
 0x114   : > { %3210 = vmatmul.mubr.msk.f32.gmra.mrb[20].mxu1 %vm1012_vm2, %v990_v36  ;;  %v992_v43 = vmax.f32 %v918_v38, 0.0 }
 0x115   : > { %v991_v41 = vmax.f32 %v913_v40, 0.0  ;;  %v3165_v42 = vpop.f32.mrb[22].mxu0 }
 0x116   : > { %v928_v44 = vadd.f32 %v3165_v42, %v3782_v37  ;;  %v922_v45 = vpop.f32.mrb[23].mxu0 }
 0x117   : > { %v923_v46 = vadd.f32 %v3782_v37, %v922_v45  ;;  %3212 = vmatprep.mubr.msk.f32.mxu1 %vm1012_vm2, %v991_v41 }
 0x118   : > { %3213 = vmatmul.mubr.msk.f32.gmra.mrb[22].mxu1 %vm1012_vm2, %v992_v43  ;;  %v994_v49 = vmax.f32 %v928_v44, 0.0 }
 0x119   : > { %v993_v47 = vmax.f32 %v923_v46, 0.0  ;;  %v3168_v48 = vpop.f32.mrb[24].mxu0 }
 0x11a   : > { %v938_v50 = vadd.f32 %v3168_v48, %v3782_v37  ;;  %v932_v51 = vpop.f32.mrb[25].mxu0 }
 0x11b   : > { %v933_v52 = vadd.f32 %v3782_v37, %v932_v51  ;;  %3215 = vmatprep.mubr.msk.f32.mxu1 %vm1012_vm2, %v993_v47 }
 0x11c   : > { %3216 = vmatmul.mubr.msk.f32.gmra.mrb[24].mxu1 %vm1012_vm2, %v994_v49  ;;  %v996_v57 = vmax.f32 %v938_v50, 0.0 }
 0x11d   : > { %v995_v53 = vmax.f32 %v933_v52, 0.0  ;;  %v3171_v56 = vpop.f32.mrb[26].mxu0 }
 0x11e   : > { %v948_v58 = vadd.f32 %v3171_v56, %v3782_v37  ;;  %v942_v59 = vpop.f32.mrb[27].mxu0 }
 0x11f   : > { %v943_v60 = vadd.f32 %v3782_v37, %v942_v59  ;;  %3218 = vmatprep.mubr.msk.f32.mxu1 %vm1012_vm2, %v995_v53 }
 0x120   : > { %3219 = vmatmul.mubr.msk.f32.gmra.mrb[26].mxu1 %vm1012_vm2, %v996_v57  ;;  %v998_v0 = vmax.f32 %v948_v58, 0.0 }
 0x121   : > { %v997_v61 = vmax.f32 %v943_v60, 0.0  ;;  %v3174_v62 = vpop.f32.mrb[28].mxu0 }
 0x122   : > { %v958_v1 = vadd.f32 %v3174_v62, %v3782_v37  ;;  %v952_v2 = vpop.f32.mrb[29].mxu0 }
 0x123   : > { %v953_v3 = vadd.f32 %v3782_v37, %v952_v2  ;;  %3221 = vmatprep.mubr.msk.f32.mxu1 %vm1012_vm2, %v997_v61  ;;  %v3863_v37 = vld [vmem:[%s4345_s4] ss:$0 sm:$0xff] }
 0x124   : > { %3222 = vmatmul.mubr.msk.f32.gmra.mrb[28].mxu1 %vm1012_vm2, %v998_v0  ;;  %v1000_v6 = vmax.f32 %v958_v1, 0.0 }
 0x125   : > { %v999_v4 = vmax.f32 %v953_v3, 0.0 }
 0x127   : > { %3224 = vmatprep.mubr.msk.f32.mxu1 %vm1012_vm2, %v999_v4 }
 0x128   : > { %3225 = vmatmul.mubr.msk.f32.gmra.mrb[30].mxu1 %vm1012_vm2, %v1000_v6 }
 0x129   : > { %3227 = vmatprep.mubr.msk.f32.mxu1 %vm1012_vm2, %v1001_v5 }
 0x12c   : > { %3228 = vmatmul.mubr.msk.f32.gmra.mrb[32].mxu1 %vm1012_vm2, %v1002_v55 }
 0x12d   : > { %1567 = vmatprep.mubr.f32.mxu1 %v1488_v9 }
 0x1c3   : > { %v3184_v54 = vpop.f32.mrb[2].mxu1 }
 0x1c4   : > { %v1181_v10 = vadd.f32 %v3184_v54, %v3863_v37  ;;  %v1175_v11 = vpop.f32.mrb[3].mxu1 }
 0x1c5   : > { %v1176_v12 = vadd.f32 %v3863_v37, %v1175_v11 }
 0x1c6   : > { %v1335_v13 = vmax.f32 %v1181_v10, 0.0 }
 0x1c7   : > { %v1334_v14 = vmax.f32 %v1176_v12, 0.0  ;;  %v3187_v15 = vpop.f32.mrb[4].mxu1 }
 0x1c8   : > { %v1191_v16 = vadd.f32 %v3187_v15, %v3863_v37  ;;  %v1185_v17 = vpop.f32.mrb[5].mxu1 }
 0x1c9   : > { %v3868_v18 = vpack.c.bf16 %v1335_v13, %v1334_v14  ;;  %v1186_v19 = vadd.f32 %v3863_v37, %v1185_v17 }
 0x1ca   : > { %v1337_v20 = vmax.f32 %v1191_v16, 0.0 }
 0x1cb   : > { %v1336_v21 = vmax.f32 %v1186_v19, 0.0  ;;  %v3190_v22 = vpop.f32.mrb[6].mxu1 }
 0x1cc   : > { %v1201_v23 = vadd.f32 %v3190_v22, %v3863_v37  ;;  %v1195_v24 = vpop.f32.mrb[7].mxu1 }
 0x1cd   : > { %v3872_v25 = vpack.c.bf16 %v1337_v20, %v1336_v21  ;;  %v1196_v26 = vadd.f32 %v3863_v37, %v1195_v24 }
 0x1ce   : > { %v1339_v27 = vmax.f32 %v1201_v23, 0.0 }
 0x1cf   : > { %v1338_v28 = vmax.f32 %v1196_v26, 0.0  ;;  %v3193_v29 = vpop.f32.mrb[8].mxu1 }
 0x1d0   : > { %v1211_v30 = vadd.f32 %v3193_v29, %v3863_v37  ;;  %v1205_v31 = vpop.f32.mrb[9].mxu1 }
 0x1d1   : > { %v3876_v32 = vpack.c.bf16 %v1339_v27, %v1338_v28  ;;  %v1206_v33 = vadd.f32 %v3863_v37, %v1205_v31 }
 0x1d2   : > { %v1341_v34 = vmax.f32 %v1211_v30, 0.0 }
 0x1d3   : > { %v1340_v35 = vmax.f32 %v1206_v33, 0.0  ;;  %v3196_v36 = vpop.f32.mrb[10].mxu1 }
 0x1d4   : > { %v1221_v38 = vadd.f32 %v3196_v36, %v3863_v37  ;;  %v1215_v39 = vpop.f32.mrb[11].mxu1 }
 0x1d5   : > { %v3880_v40 = vpack.c.bf16 %v1341_v34, %v1340_v35  ;;  %v1216_v41 = vadd.f32 %v3863_v37, %v1215_v39 }
 0x1d6   : > { %v1343_v42 = vmax.f32 %v1221_v38, 0.0 }
 0x1d7   : > { %v1342_v43 = vmax.f32 %v1216_v41, 0.0  ;;  %v3199_v44 = vpop.f32.mrb[12].mxu1 }
 0x1d8   : > { %v1231_v45 = vadd.f32 %v3199_v44, %v3863_v37  ;;  %v1225_v46 = vpop.f32.mrb[13].mxu1 }
 0x1d9   : > { %v3884_v47 = vpack.c.bf16 %v1343_v42, %v1342_v43  ;;  %v1226_v48 = vadd.f32 %v3863_v37, %v1225_v46 }
 0x1da   : > { %v1345_v49 = vmax.f32 %v1231_v45, 0.0 }
 0x1db   : > { %v1344_v50 = vmax.f32 %v1226_v48, 0.0  ;;  %v3202_v51 = vpop.f32.mrb[14].mxu1 }
 0x1dc   : > { %v1241_v52 = vadd.f32 %v3202_v51, %v3863_v37  ;;  %v1235_v53 = vpop.f32.mrb[15].mxu1 }
 0x1dd   : > { %v3888_v56 = vpack.c.bf16 %v1345_v49, %v1344_v50  ;;  %v1236_v57 = vadd.f32 %v3863_v37, %v1235_v53 }
 0x1de   : > { %v1347_v58 = vmax.f32 %v1241_v52, 0.0 }
 0x1df   : > { %v1346_v59 = vmax.f32 %v1236_v57, 0.0  ;;  %v3205_v60 = vpop.f32.mrb[16].mxu1 }
 0x1e0   : > { %v1251_v61 = vadd.f32 %v3205_v60, %v3863_v37  ;;  %v1245_v62 = vpop.f32.mrb[17].mxu1 }
 0x1e1   : > { %v3892_v63 = vpack.c.bf16 %v1347_v58, %v1346_v59  ;;  %v1246_v0 = vadd.f32 %v3863_v37, %v1245_v62 }
 0x1e2   : > { %v1349_v1 = vmax.f32 %v1251_v61, 0.0 }
 0x1e3   : > { %v1348_v2 = vmax.f32 %v1246_v0, 0.0  ;;  %v3208_v3 = vpop.f32.mrb[18].mxu1 }
 0x1e4   : > { %v1261_v4 = vadd.f32 %v3208_v3, %v3863_v37  ;;  %v1255_v5 = vpop.f32.mrb[19].mxu1 }
 0x1e5   : > { %v3896_v6 = vpack.c.bf16 %v1349_v1, %v1348_v2  ;;  %v1256_v7 = vadd.f32 %v3863_v37, %v1255_v5  ;;  %v1369_v5 = vld [vmem:[%s4346_s5 + $0x18] sm:$0xff] }
 0x1e6   : > { %v1351_v55 = vmax.f32 %v1261_v4, 0.0  ;;  %v1487_v4 = vld [vmem:[%s4347_s6] sm:$0xff] }
 0x1e7   : > { %v1350_v8 = vmax.f32 %v1256_v7, 0.0  ;;  %v3211_v9 = vpop.f32.mrb[20].mxu1  ;;  %v1490_v7 = vld [vmem:[%s4347_s6 + $0x18] sm:$0xff] }
 0x1e8   : > { %v1271_v54 = vadd.f32 %v3211_v9, %v3863_v37  ;;  %v1265_v10 = vpop.f32.mrb[21].mxu1  ;;  %v1492_v9 = vld [vmem:[%s4347_s6 + $0x28] sm:$0xff] }
 0x1e9   : > { %v3900_v11 = vpack.c.bf16 %v1351_v55, %v1350_v8  ;;  %v1266_v12 = vadd.f32 %v3863_v37, %v1265_v10  ;;  %v1368_v55 = vld [vmem:[%s4346_s5 + $0x10] sm:$0xff]  ;;  %v1491_v10 = vld [vmem:[%s4347_s6 + $0x20] sm:$0xff] }
 0x1ea   : > { %v1353_v13 = vmax.f32 %v1271_v54, 0.0  ;;  %v1489_v8 = vld [vmem:[%s4347_s6 + $0x10] sm:$0xff]  ;;  %v1370_v54 = vld [vmem:[%s4346_s5 + $0x20] sm:$0xff] }
 0x1eb   : > { %v1352_v14 = vmax.f32 %v1266_v12, 0.0  ;;  %v3214_v15 = vpop.f32.mrb[22].mxu1  ;;  %3358 = vmatprep.subr.bf16.mxu0 %v3900_v11  ;;  %3390 = vmatprep.subr.bf16.mxu1 %v3900_v11  ;;  %v1372_v12 = vld [vmem:[%s4346_s5 + $0x30] sm:$0xff] }
 0x1ec   : > { %v1281_v16 = vadd.f32 %v3214_v15, %v3863_v37  ;;  %v1275_v17 = vpop.f32.mrb[23].mxu1  ;;  %3360 = vmatpush3.bf16.msra.mxu0 %v3868_v18  ;;  %3392 = vmatpush3.bf16.msra.mxu1 %v3868_v18  ;;  %v1374_v15 = vld [vmem:[%s4346_s5 + $0x40] sm:$0xff] }
 0x1ed   : > { %v3908_v19 = vpack.c.bf16 %v1353_v13, %v1352_v14  ;;  %v1276_v20 = vadd.f32 %v3863_v37, %v1275_v17  ;;  %v1493_v13 = vld [vmem:[%s4347_s6 + $0x30] sm:$0xff]  ;;  %v1496_v14 = vld [vmem:[%s4347_s6 + $0x48] sm:$0xff]  ;;  %v1498_v17 = vld [vmem:[%s4347_s6 + $0x58] sm:$0xff] }
 0x1ee   : > { %v1355_v21 = vmax.f32 %v1281_v16, 0.0  ;;  %v1495_v16 = vld [vmem:[%s4347_s6 + $0x40] sm:$0xff] }
 0x1ef   : > { %v1354_v22 = vmax.f32 %v1276_v20, 0.0  ;;  %v3217_v23 = vpop.f32.mrb[24].mxu1  ;;  %3362 = vmatprep.subr.bf16.mxu0 %v3908_v19  ;;  %3394 = vmatprep.subr.bf16.mxu1 %v3908_v19  ;;  %v1497_v20 = vld [vmem:[%s4347_s6 + $0x50] sm:$0xff] }
 0x1f0   : > { %v1291_v24 = vadd.f32 %v3217_v23, %v3863_v37  ;;  %v1285_v26 = vpop.f32.mrb[25].mxu1  ;;  %3364 = vmatpush3.bf16.msra.mxu0 %v3872_v25  ;;  %3396 = vmatpush3.bf16.msra.mxu1 %v3872_v25  ;;  %v1499_v23 = vld [vmem:[%s4347_s6 + $0x60] sm:$0xff] }
 0x1f1   : > { %v3916_v27 = vpack.c.bf16 %v1355_v21, %v1354_v22  ;;  %v1286_v28 = vadd.f32 %v3863_v37, %v1285_v26  ;;  %v1500_v21 = vld [vmem:[%s4347_s6 + $0x68] sm:$0xff]  ;;  %v1378_v22 = vld [vmem:[%s4346_s5 + $0x60] sm:$0xff]  ;;  %v1380_v26 = vld [vmem:[%s4346_s5 + $0x70] sm:$0xff] }
 0x1f2   : > { %v1357_v29 = vmax.f32 %v1291_v24, 0.0  ;;  %v1502_v24 = vld [vmem:[%s4347_s6 + $0x78] sm:$0xff] }
 0x1f3   : > { %v1356_v30 = vmax.f32 %v1286_v28, 0.0  ;;  %v3220_v31 = vpop.f32.mrb[26].mxu1  ;;  %3366 = vmatprep.subr.bf16.mxu0 %v3916_v27  ;;  %3398 = vmatprep.subr.bf16.mxu1 %v3916_v27  ;;  %v1609_v28 = vld [vmem:[%s4348_s7 + $0x8] sm:$0xff] }
 0x1f4   : > { %v1301_v33 = vadd.f32 %v3220_v31, %v3863_v37  ;;  %v1295_v34 = vpop.f32.mrb[27].mxu1  ;;  %3368 = vmatpush3.bf16.msra.mxu0 %v3876_v32  ;;  %3400 = vmatpush3.bf16.msra.mxu1 %v3876_v32  ;;  %v1611_v31 = vld [vmem:[%s4348_s7 + $0x18] sm:$0xff] }
 0x1f5   : > { %v3924_v35 = vpack.c.bf16 %v1357_v29, %v1356_v30  ;;  %v1296_v36 = vadd.f32 %v3863_v37, %v1295_v34  ;;  %v1608_v29 = vld [vmem:[%s4348_s7] sm:$0xff]  ;;  %v1731_v34 = vld [vmem:[%s4349_s8 + $0x10] sm:$0xff] }
 0x1f6   : > { %v1359_v38 = vmax.f32 %v1301_v33, 0.0  ;;  %v1729_v30 = vld [vmem:[%s4349_s8] sm:$0xff]  ;;  %v1732_v33 = vld [vmem:[%s4349_s8 + $0x18] sm:$0xff] }
 0x1f7   : > { %v1358_v39 = vmax.f32 %v1296_v36, 0.0  ;;  %v3223_v41 = vpop.f32.mrb[28].mxu1  ;;  %3370 = vmatprep.subr.bf16.mxu0 %v3924_v35  ;;  %3402 = vmatprep.subr.bf16.mxu1 %v3924_v35  ;;  %v1734_v36 = vld [vmem:[%s4349_s8 + $0x28] sm:$0xff] }
 0x1f8   : > { %v1311_v42 = vadd.f32 %v3223_v41, %v3863_v37  ;;  %v1305_v43 = vpop.f32.mrb[29].mxu1  ;;  %3372 = vmatpush3.bf16.msra.mxu0 %v3880_v40  ;;  %3404 = vmatpush3.bf16.msra.mxu1 %v3880_v40  ;;  %v1615_v41 = vld [vmem:[%s4348_s7 + $0x38] sm:$0xff] }
 0x1f9   : > { %v3932_v44 = vpack.c.bf16 %v1359_v38, %v1358_v39  ;;  %v1306_v45 = vadd.f32 %v3863_v37, %v1305_v43  ;;  %v1612_v38 = vld [vmem:[%s4348_s7 + $0x20] sm:$0xff]  ;;  %v1614_v43 = vld [vmem:[%s4348_s7 + $0x30] sm:$0xff] }
 0x1fa   : > { %v1361_v46 = vmax.f32 %v1311_v42, 0.0  ;;  %v1733_v39 = vld [vmem:[%s4349_s8 + $0x20] sm:$0xff]  ;;  %v1736_v42 = vld [vmem:[%s4349_s8 + $0x38] sm:$0xff] }
 0x1fb   : > { %v1360_v48 = vmax.f32 %v1306_v45, 0.0  ;;  %v3226_v49 = vpop.f32.mrb[30].mxu1  ;;  %3374 = vmatprep.subr.bf16.mxu0 %v3932_v44  ;;  %3406 = vmatprep.subr.bf16.mxu1 %v3932_v44  ;;  %v1617_v45 = vld [vmem:[%s4348_s7 + $0x48] sm:$0xff] }
 0x1fc   : > { %v1321_v50 = vadd.f32 %v3226_v49, %v3863_v37  ;;  %v1315_v51 = vpop.f32.mrb[31].mxu1  ;;  %3376 = vmatpush3.bf16.msra.mxu0 %v3884_v47  ;;  %3408 = vmatpush3.bf16.msra.mxu1 %v3884_v47  ;;  %v1737_v49 = vld [vmem:[%s4349_s8 + $0x40] sm:$0xff] }
 0x1fd   : > { %v3940_v52 = vpack.c.bf16 %v1361_v46, %v1360_v48  ;;  %v1316_v53 = vadd.f32 %v3863_v37, %v1315_v51  ;;  %v1738_v46 = vld [vmem:[%s4349_s8 + $0x48] sm:$0xff]  ;;  %v1616_v48 = vld [vmem:[%s4348_s7 + $0x40] sm:$0xff]  ;;  %v1740_v51 = vld [vmem:[%s4349_s8 + $0x58] sm:$0xff] }
 0x1fe   : > { %v1363_v57 = vmax.f32 %v1321_v50, 0.0  ;;  %v1619_v50 = vld [vmem:[%s4348_s7 + $0x58] sm:$0xff] }
 0x1ff   : > { %v1362_v58 = vmax.f32 %v1316_v53, 0.0  ;;  %v3229_v59 = vpop.f32.mrb[32].mxu1  ;;  %3378 = vmatprep.subr.bf16.mxu0 %v3940_v52  ;;  %3410 = vmatprep.subr.bf16.mxu1 %v3940_v52  ;;  %v1739_v53 = vld [vmem:[%s4349_s8 + $0x50] sm:$0xff] }
 0x200   : > { %v1331_v60 = vadd.f32 %v3229_v59, %v3863_v37  ;;  %v1325_v61 = vpop.f32.mrb[33].mxu1  ;;  %3380 = vmatpush3.bf16.msra.mxu0 %v3888_v56  ;;  %3412 = vmatpush3.bf16.msra.mxu1 %v3888_v56  ;;  %v1620_v59 = vld [vmem:[%s4348_s7 + $0x60] sm:$0xff] }
 0x201   : > { %v3948_v62 = vpack.c.bf16 %v1363_v57, %v1362_v58  ;;  %v1326_v0 = vadd.f32 %v3863_v37, %v1325_v61  ;;  %v1366_v37 = vld [vmem:[%s4346_s5] sm:$0xff]  ;;  %v1621_v57 = vld [vmem:[%s4348_s7 + $0x68] sm:$0xff]  ;;  %v1623_v61 = vld [vmem:[%s4348_s7 + $0x78] sm:$0xff] }
 0x202   : > { %v1365_v1 = vmax.f32 %v1331_v60, 0.0  ;;  %v1742_v58 = vld [vmem:[%s4349_s8 + $0x68] sm:$0xff]  ;;  %v1741_v60 = vld [vmem:[%s4349_s8 + $0x60] sm:$0xff] }
 0x203   : > { %v1364_v2 = vmax.f32 %v1326_v0, 0.0  ;;  %3382 = vmatprep.subr.bf16.mxu0 %v3948_v62  ;;  %3414 = vmatprep.subr.bf16.mxu1 %v3948_v62  ;;  %v1622_v0 = vld [vmem:[%s4348_s7 + $0x70] sm:$0xff] }
 0x204   : > { %3384 = vmatpush3.bf16.msra.mxu0 %v3892_v63  ;;  %3416 = vmatpush3.bf16.msra.mxu1 %v3892_v63 }
 0x205   : > { %v3955_v3 = vpack.c.bf16 %v1365_v1, %v1364_v2  ;;  %v1743_v1 = vld [vmem:[%s4349_s8 + $0x70] sm:$0xff]  ;;  %v1874_v2 = vld [vmem:[%s4350_s9] sm:$0xff] }
 0x207   : > { %3386 = vmatprep.subr.bf16.mxu0 %v3955_v3  ;;  %3418 = vmatprep.subr.bf16.mxu1 %v3955_v3 }
 0x208   : > { %3388 = vmatpush3.bf16.msra.mxu0 %v3896_v6  ;;  %3420 = vmatpush3.bf16.msra.mxu1 %v3896_v6 }
 0x209   : > { %3422 = vmatprep.subr.bf16.mxu0 %v3900_v11  ;;  %3454 = vmatprep.subr.bf16.mxu1 %v3900_v11  ;;  %v1494_v11 = vld [vmem:[%s4347_s6 + $0x38] sm:$0xff] }
 0x20b   : > { %1447 = vmatmul.mubr.f32.vlgmr.msra.gmra.mrb[30].mxu0 %v1366_v37  ;;  %1568 = vmatmul.mubr.f32.vlgmr.msra.gmra.mrb[34].mxu1 %v1487_v4  ;;  %v1876_v4 = vld [vmem:[%s4350_s9 + $0x10] sm:$0xff] }
 0x20c   : > { %3424 = vmatpush3.bf16.msra.mxu0 %v3868_v18  ;;  %3456 = vmatpush3.bf16.msra.mxu1 %v3868_v18  ;;  %v1371_v18 = vld [vmem:[%s4346_s5 + $0x28] sm:$0xff] }
 0x20d   : > { %3426 = vmatprep.subr.bf16.mxu0 %v3908_v19  ;;  %3458 = vmatprep.subr.bf16.mxu1 %v3908_v19  ;;  %v1376_v19 = vld [vmem:[%s4346_s5 + $0x50] sm:$0xff] }
 0x20e   : > { %1451 = vmatprep.mubr.f32.mxu0 %v1369_v5  ;;  %1572 = vmatprep.mubr.f32.mxu1 %v1490_v7  ;;  %v1877_v5 = vld [vmem:[%s4350_s9 + $0x18] sm:$0xff] }
 0x20f   : > { %1452 = vmatmul.mubr.f32.gmra.mrb[32].mxu0 %v1368_v55  ;;  %1573 = vmatmul.mubr.f32.gmra.mrb[36].mxu1 %v1489_v8  ;;  %v3489_v7 = vpack.c.bf16 %v1877_v5, %v1876_v4 }
 0x210   : > { %3428 = vmatpush3.bf16.msra.mxu0 %v3872_v25  ;;  %3460 = vmatpush3.bf16.msra.mxu1 %v3872_v25  ;;  %v1373_v25 = vld [vmem:[%s4346_s5 + $0x38] sm:$0xff] }
 0x211   : > { %3430 = vmatprep.subr.bf16.mxu0 %v3916_v27  ;;  %3462 = vmatprep.subr.bf16.mxu1 %v3916_v27  ;;  %v1501_v27 = vld [vmem:[%s4347_s6 + $0x70] sm:$0xff] }
 0x212   : > { %1456 = vmatprep.mubr.f32.mxu0 %v1371_v18  ;;  %1577 = vmatprep.mubr.f32.mxu1 %v1492_v9 }
 0x213   : > { %1457 = vmatmul.mubr.f32.gmra.mrb[34].mxu0 %v1370_v54  ;;  %1578 = vmatmul.mubr.f32.gmra.mrb[38].mxu1 %v1491_v10 }
 0x214   : > { %3432 = vmatpush3.bf16.msra.mxu0 %v3876_v32  ;;  %3464 = vmatpush3.bf16.msra.mxu1 %v3876_v32  ;;  %v1375_v32 = vld [vmem:[%s4346_s5 + $0x48] sm:$0xff] }
 0x215   : > { %3434 = vmatprep.subr.bf16.mxu0 %v3924_v35  ;;  %3466 = vmatprep.subr.bf16.mxu1 %v3924_v35  ;;  %v1613_v35 = vld [vmem:[%s4348_s7 + $0x28] sm:$0xff] }
 0x216   : > { %1461 = vmatprep.mubr.f32.mxu0 %v1373_v25  ;;  %1582 = vmatprep.mubr.f32.mxu1 %v1494_v11 }
 0x217   : > { %1462 = vmatmul.mubr.f32.gmra.mrb[36].mxu0 %v1372_v12  ;;  %1583 = vmatmul.mubr.f32.gmra.mrb[40].mxu1 %v1493_v13 }
 0x218   : > { %3436 = vmatpush3.bf16.msra.mxu0 %v3880_v40  ;;  %3468 = vmatpush3.bf16.msra.mxu1 %v3880_v40  ;;  %v1377_v40 = vld [vmem:[%s4346_s5 + $0x58] sm:$0xff] }
 0x219   : > { %3438 = vmatprep.subr.bf16.mxu0 %v3932_v44  ;;  %3470 = vmatprep.subr.bf16.mxu1 %v3932_v44  ;;  %v1735_v44 = vld [vmem:[%s4349_s8 + $0x30] sm:$0xff] }
 0x21a   : > { %1466 = vmatprep.mubr.f32.mxu0 %v1375_v32  ;;  %1587 = vmatprep.mubr.f32.mxu1 %v1496_v14 }
 0x21b   : > { %1467 = vmatmul.mubr.f32.gmra.mrb[38].mxu0 %v1374_v15  ;;  %1588 = vmatmul.mubr.f32.gmra.mrb[42].mxu1 %v1495_v16 }
 0x21c   : > { %3440 = vmatpush3.bf16.msra.mxu0 %v3884_v47  ;;  %3472 = vmatpush3.bf16.msra.mxu1 %v3884_v47  ;;  %v1379_v47 = vld [vmem:[%s4346_s5 + $0x68] sm:$0xff] }
 0x21d   : > { %3442 = vmatprep.subr.bf16.mxu0 %v3940_v52  ;;  %3474 = vmatprep.subr.bf16.mxu1 %v3940_v52  ;;  %v1618_v52 = vld [vmem:[%s4348_s7 + $0x50] sm:$0xff] }
 0x21e   : > { %1471 = vmatprep.mubr.f32.mxu0 %v1377_v40  ;;  %1592 = vmatprep.mubr.f32.mxu1 %v1498_v17 }
 0x21f   : > { %1472 = vmatmul.mubr.f32.gmra.mrb[40].mxu0 %v1376_v19  ;;  %1593 = vmatmul.mubr.f32.gmra.mrb[44].mxu1 %v1497_v20 }
 0x220   : > { %3444 = vmatpush3.bf16.msra.mxu0 %v3888_v56  ;;  %3476 = vmatpush3.bf16.msra.mxu1 %v3888_v56  ;;  %v1381_v56 = vld [vmem:[%s4346_s5 + $0x78] sm:$0xff] }
 0x221   : > { %3446 = vmatprep.subr.bf16.mxu0 %v3948_v62  ;;  %3478 = vmatprep.subr.bf16.mxu1 %v3948_v62  ;;  %v1744_v62 = vld [vmem:[%s4349_s8 + $0x78] sm:$0xff] }
 0x222   : > { %1476 = vmatprep.mubr.f32.mxu0 %v1379_v47  ;;  %1597 = vmatprep.mubr.f32.mxu1 %v1500_v21 }
 0x223   : > { %1477 = vmatmul.mubr.f32.gmra.mrb[42].mxu0 %v1378_v22  ;;  %1598 = vmatmul.mubr.f32.gmra.mrb[46].mxu1 %v1499_v23 }
 0x224   : > { %3448 = vmatpush3.bf16.msra.mxu0 %v3892_v63  ;;  %3480 = vmatpush3.bf16.msra.mxu1 %v3892_v63  ;;  %v1730_v63 = vld [vmem:[%s4349_s8 + $0x8] sm:$0xff] }
 0x225   : > { %3450 = vmatprep.subr.bf16.mxu0 %v3955_v3  ;;  %3482 = vmatprep.subr.bf16.mxu1 %v3955_v3  ;;  %v1875_v3 = vld [vmem:[%s4350_s9 + $0x8] sm:$0xff] }
 0x226   : > { %1481 = vmatprep.mubr.f32.mxu0 %v1381_v56  ;;  %1602 = vmatprep.mubr.f32.mxu1 %v1502_v24  ;;  %v3485_v37 = vpack.c.bf16 %v1875_v3, %v1874_v2 }
 0x227   : > { %1482 = vmatmul.mubr.f32.gmra.mrb[44].mxu0 %v1380_v26  ;;  %1603 = vmatmul.mubr.f32.gmra.mrb[48].mxu1 %v1501_v27 }
 0x228   : > { %3452 = vmatpush3.bf16.msra.mxu0 %v3896_v6  ;;  %3484 = vmatpush3.bf16.msra.mxu1 %v3896_v6  ;;  %v1610_v6 = vld [vmem:[%s4348_s7 + $0x10] sm:$0xff] }
 0x229   : > { %1688 = vmatprep.mubr.f32.mxu0 %v1609_v28  ;;  %1809 = vmatprep.mubr.f32.mxu1 %v1730_v63 }
 0x22a   : > { %3486 = vmatprep.subr.bf16.mxu0 %v3485_v37 }
 0x22b   : > { %1689 = vmatmul.mubr.f32.vlgmr.msra.gmra.mrb[46].mxu0 %v1608_v29  ;;  %1810 = vmatmul.mubr.f32.vlgmr.msra.gmra.mrb[50].mxu1 %v1729_v30 }
 0x22c   : > { %1693 = vmatprep.mubr.f32.mxu0 %v1611_v31  ;;  %1814 = vmatprep.mubr.f32.mxu1 %v1732_v33 }
 0x22d   : > { %3488 = vmatpush3.bf16.msra.mxu0 %v3485_v37 }
 0x22e   : > { %3490 = vmatprep.subr.bf16.mxu0 %v3489_v7 }
 0x22f   : > { %1694 = vmatmul.mubr.f32.gmra.mrb[48].mxu0 %v1610_v6  ;;  %1815 = vmatmul.mubr.f32.gmra.mrb[52].mxu1 %v1731_v34 }
 0x230   : > { %1698 = vmatprep.mubr.f32.mxu0 %v1613_v35  ;;  %1819 = vmatprep.mubr.f32.mxu1 %v1734_v36 }
 0x231   : > { %3492 = vmatpush3.bf16.msra.mxu0 %v3489_v7 }
 0x233   : > { %1699 = vmatmul.mubr.f32.gmra.mrb[50].mxu0 %v1612_v38  ;;  %1820 = vmatmul.mubr.f32.gmra.mrb[54].mxu1 %v1733_v39 }
 0x234   : > { %1703 = vmatprep.mubr.f32.mxu0 %v1615_v41  ;;  %1824 = vmatprep.mubr.f32.mxu1 %v1736_v42 }
 0x237   : > { %1704 = vmatmul.mubr.f32.gmra.mrb[52].mxu0 %v1614_v43  ;;  %1825 = vmatmul.mubr.f32.gmra.mrb[56].mxu1 %v1735_v44 }
 0x238   : > { %1708 = vmatprep.mubr.f32.mxu0 %v1617_v45  ;;  %1829 = vmatprep.mubr.f32.mxu1 %v1738_v46 }
 0x23b   : > { %1709 = vmatmul.mubr.f32.gmra.mrb[54].mxu0 %v1616_v48  ;;  %1830 = vmatmul.mubr.f32.gmra.mrb[58].mxu1 %v1737_v49 }
 0x23c   : > { %1713 = vmatprep.mubr.f32.mxu0 %v1619_v50  ;;  %1834 = vmatprep.mubr.f32.mxu1 %v1740_v51 }
 0x23f   : > { %1714 = vmatmul.mubr.f32.gmra.mrb[56].mxu0 %v1618_v52  ;;  %1835 = vmatmul.mubr.f32.gmra.mrb[60].mxu1 %v1739_v53 }
 0x240   : > { %1718 = vmatprep.mubr.f32.mxu0 %v1621_v57  ;;  %1839 = vmatprep.mubr.f32.mxu1 %v1742_v58 }
 0x243   : > { %1719 = vmatmul.mubr.f32.gmra.mrb[58].mxu0 %v1620_v59  ;;  %1840 = vmatmul.mubr.f32.gmra.mrb[62].mxu1 %v1741_v60 }
 0x244   : > { %1723 = vmatprep.mubr.f32.mxu0 %v1623_v61  ;;  %1844 = vmatprep.mubr.f32.mxu1 %v1744_v62 }
 0x247   : > { %1724 = vmatmul.mubr.f32.gmra.mrb[60].mxu0 %v1622_v0  ;;  %1845 = vmatmul.mubr.f32.gmra.mrb[64].mxu1 %v1743_v1 }
 0x2de   : > { %v2868_v55 = vpop.f32.mrb[30].mxu0  ;;  %v2924_v8 = vpop.f32.mrb[34].mxu1 }
 0x2df   : > { %v2869_v18 = vpop.f32.mrb[31].mxu0  ;;  %v2925_v9 = vpop.f32.mrb[35].mxu1 }
 0x2e0   : > { %v4191_v54 = vadd.f32 %v2869_v18, %v2868_v55  ;;  %v4193_v10 = vadd.f32 %v2925_v9, %v2924_v8 }
 0x2e2   : > { %v1850_v25 = vmax.f32 %v4191_v54, %v4193_v10  ;;  %v2871_v11 = vpop.f32.mrb[32].mxu0  ;;  %v2927_v12 = vpop.f32.mrb[36].mxu1 }
 0x2e3   : > { %v2872_v13 = vpop.f32.mrb[33].mxu0  ;;  %v2928_v32 = vpop.f32.mrb[37].mxu1 }
 0x2e4   : > { %v4197_v14 = vadd.f32 %v2872_v13, %v2871_v11  ;;  %v4199_v15 = vadd.f32 %v2928_v32, %v2927_v12 }
 0x2e6   : > { %v1851_v16 = vmax.f32 %v4197_v14, %v4199_v15  ;;  %v2874_v40 = vpop.f32.mrb[34].mxu0  ;;  %v2930_v17 = vpop.f32.mrb[38].mxu1 }
 0x2e7   : > { %v2875_v19 = vpop.f32.mrb[35].mxu0  ;;  %v2931_v20 = vpop.f32.mrb[39].mxu1 }
 0x2e8   : > { %v4203_v47 = vadd.f32 %v2875_v19, %v2874_v40  ;;  %v4205_v21 = vadd.f32 %v2931_v20, %v2930_v17 }
 0x2ea   : > { %v1852_v22 = vmax.f32 %v4203_v47, %v4205_v21  ;;  %v2877_v23 = vpop.f32.mrb[36].mxu0  ;;  %v2933_v56 = vpop.f32.mrb[40].mxu1 }
 0x2eb   : > { %v2878_v24 = vpop.f32.mrb[37].mxu0  ;;  %v2934_v26 = vpop.f32.mrb[41].mxu1 }
 0x2ec   : > { %v4209_v27 = vadd.f32 %v2878_v24, %v2877_v23  ;;  %v4211_v28 = vadd.f32 %v2934_v26, %v2933_v56 }
 0x2ee   : > { %v1853_v63 = vmax.f32 %v4209_v27, %v4211_v28  ;;  %v2880_v29 = vpop.f32.mrb[38].mxu0  ;;  %v2936_v30 = vpop.f32.mrb[42].mxu1 }
 0x2ef   : > { %v2881_v31 = vpop.f32.mrb[39].mxu0  ;;  %v2937_v33 = vpop.f32.mrb[43].mxu1 }
 0x2f0   : > { %v4215_v6 = vadd.f32 %v2881_v31, %v2880_v29  ;;  %v4217_v34 = vadd.f32 %v2937_v33, %v2936_v30 }
 0x2f2   : > { %v1854_v35 = vmax.f32 %v4215_v6, %v4217_v34  ;;  %v2883_v36 = vpop.f32.mrb[40].mxu0  ;;  %v2939_v38 = vpop.f32.mrb[44].mxu1 }
 0x2f3   : > { %v2884_v39 = vpop.f32.mrb[41].mxu0  ;;  %v2940_v41 = vpop.f32.mrb[45].mxu1 }
 0x2f4   : > { %v4221_v42 = vadd.f32 %v2884_v39, %v2883_v36  ;;  %v4223_v43 = vadd.f32 %v2940_v41, %v2939_v38 }
 0x2f6   : > { %v1855_v44 = vmax.f32 %v4221_v42, %v4223_v43  ;;  %v2886_v45 = vpop.f32.mrb[42].mxu0  ;;  %v2942_v46 = vpop.f32.mrb[46].mxu1  ;;  %v2023_v43 = vld [vmem:[%s4352_s11] sm:$0xff] }
 0x2f7   : > { %v2887_v48 = vpop.f32.mrb[43].mxu0  ;;  %v2943_v49 = vpop.f32.mrb[47].mxu1 }
 0x2f8   : > { %v4227_v50 = vadd.f32 %v2887_v48, %v2886_v45  ;;  %v4229_v51 = vadd.f32 %v2943_v49, %v2942_v46 }
 0x2fa   : > { %v1856_v52 = vmax.f32 %v4227_v50, %v4229_v51  ;;  %v2889_v53 = vpop.f32.mrb[44].mxu0  ;;  %v2945_v57 = vpop.f32.mrb[48].mxu1  ;;  %v2736_v51 = vld [vmem:[%s4351_s10] ss:$0 sm:$0xff] }
 0x2fb   : > { %v2890_v58 = vpop.f32.mrb[45].mxu0  ;;  %v2946_v59 = vpop.f32.mrb[49].mxu1 }
 0x2fc   : > { %v4233_v60 = vadd.f32 %v2890_v58, %v2889_v53  ;;  %v4235_v61 = vadd.f32 %v2946_v59, %v2945_v57 }
 0x2fe   : > { %v1857_v62 = vmax.f32 %v4233_v60, %v4235_v61  ;;  %v2980_v0 = vpop.f32.mrb[46].mxu0  ;;  %v3036_v1 = vpop.f32.mrb[50].mxu1 }
 0x2ff   : > { %v2981_v2 = vpop.f32.mrb[47].mxu0  ;;  %v3037_v3 = vpop.f32.mrb[51].mxu1 }
 0x300   : > { %v2982_v37 = vadd.f32 %v2981_v2, %v2980_v0  ;;  %v3038_v4 = vadd.f32 %v3037_v3, %v3036_v1 }
 0x302   : > { %v1858_v5 = vmax.f32 %v2982_v37, %v3038_v4  ;;  %v2983_v7 = vpop.f32.mrb[48].mxu0  ;;  %v3039_v55 = vpop.f32.mrb[52].mxu1 }
 0x303   : > { %v2984_v8 = vpop.f32.mrb[49].mxu0  ;;  %v3040_v18 = vpop.f32.mrb[53].mxu1 }
 0x304   : > { %v1866_v9 = vmax.f32 %v1850_v25, %v1858_v5  ;;  %v2985_v54 = vadd.f32 %v2984_v8, %v2983_v7  ;;  %v3041_v10 = vadd.f32 %v3040_v18, %v3039_v55 }
 0x306   : > { %v1859_v11 = vmax.f32 %v2985_v54, %v3041_v10  ;;  %v2986_v12 = vpop.f32.mrb[50].mxu0  ;;  %v3042_v13 = vpop.f32.mrb[54].mxu1  ;;  %3238 = vmatprep.mubr.msk.f32.mxu0 %vm1885_vm3, %v1866_v9 }
 0x307   : > { %v2987_v32 = vpop.f32.mrb[51].mxu0  ;;  %v3043_v40 = vpop.f32.mrb[55].mxu1 }
 0x308   : > { %v1867_v17 = vmax.f32 %v1851_v16, %v1859_v11  ;;  %v2988_v19 = vadd.f32 %v2987_v32, %v2986_v12  ;;  %v3044_v20 = vadd.f32 %v3043_v40, %v3042_v13 }
 0x30a   : > { %v1860_v23 = vmax.f32 %v2988_v19, %v3044_v20  ;;  %v2989_v56 = vpop.f32.mrb[52].mxu0  ;;  %v3045_v24 = vpop.f32.mrb[56].mxu1  ;;  %3239 = vmatmul.mubr.msk.f32.vlgmr.msra.gmra.mrb[62].mxu0 %vm1885_vm3, %v1867_v17 }
 0x30b   : > { %v2990_v25 = vpop.f32.mrb[53].mxu0  ;;  %v3046_v26 = vpop.f32.mrb[57].mxu1 }
 0x30c   : > { %v1868_v29 = vmax.f32 %v1852_v22, %v1860_v23  ;;  %v2991_v30 = vadd.f32 %v2990_v25, %v2989_v56  ;;  %v3047_v31 = vadd.f32 %v3046_v26, %v3045_v24 }
 0x30e   : > { %v1861_v33 = vmax.f32 %v2991_v30, %v3047_v31  ;;  %v2992_v36 = vpop.f32.mrb[54].mxu0  ;;  %v3048_v38 = vpop.f32.mrb[58].mxu1  ;;  %3241 = vmatprep.mubr.msk.f32.mxu0 %vm1885_vm3, %v1868_v29  ;;  %v2169_v30 = vld [vmem:[%s4354_s13] sm:$0xff] }
 0x30f   : > { %v2993_v14 = vpop.f32.mrb[55].mxu0  ;;  %v3049_v15 = vpop.f32.mrb[59].mxu1  ;;  %v2253_v31 = vld [vmem:[%s4355_s14] sm:$0xff] }
 0x310   : > { %v1869_v16 = vmax.f32 %v1853_v63, %v1861_v33  ;;  %v2994_v39 = vadd.f32 %v2993_v14, %v2992_v36  ;;  %v3050_v41 = vadd.f32 %v3049_v15, %v3048_v38  ;;  %v2745_v33 = vld [vmem:[%s4353_s12] ss:$0 sm:$0xff] }
 0x312   : > { %v1862_v45 = vmax.f32 %v2994_v39, %v3050_v41  ;;  %v2995_v46 = vpop.f32.mrb[56].mxu0  ;;  %v3051_v48 = vpop.f32.mrb[60].mxu1  ;;  %3242 = vmatmul.mubr.msk.f32.gmra.mrb[64].mxu0 %vm1885_vm3, %v1869_v16 }
 0x313   : > { %v2996_v47 = vpop.f32.mrb[57].mxu0  ;;  %v3052_v21 = vpop.f32.mrb[61].mxu1 }
 0x314   : > { %v1870_v22 = vmax.f32 %v1854_v35, %v1862_v45  ;;  %v2997_v49 = vadd.f32 %v2996_v47, %v2995_v46  ;;  %v3053_v53 = vadd.f32 %v3052_v21, %v3051_v48 }
 0x316   : > { %v1863_v57 = vmax.f32 %v2997_v49, %v3053_v53  ;;  %v2998_v58 = vpop.f32.mrb[58].mxu0  ;;  %v3054_v59 = vpop.f32.mrb[62].mxu1  ;;  %3244 = vmatprep.mubr.msk.f32.mxu0 %vm1885_vm3, %v1870_v22 }
 0x317   : > { %v2999_v27 = vpop.f32.mrb[59].mxu0  ;;  %v3055_v28 = vpop.f32.mrb[63].mxu1 }
 0x318   : > { %v1871_v63 = vmax.f32 %v1855_v44, %v1863_v57  ;;  %v3000_v0 = vadd.f32 %v2999_v27, %v2998_v58  ;;  %v3056_v1 = vadd.f32 %v3055_v28, %v3054_v59  ;;  %v2024_v44 = vld [vmem:[%s4352_s11 + $0x8] sm:$0xff] }
 0x319   : > { %v3493_v50 = vpack.c.bf16 %v2024_v44, %v2023_v43  ;;  %v2420_v43 = vld [vmem:[%s4357_s16 + $0x8] sm:$0xff]  ;;  %v2508_v44 = vld [vmem:[%s4358_s17] sm:$0xff] }
 0x31a   : > { %v1864_v2 = vmax.f32 %v3000_v0, %v3056_v1  ;;  %v3001_v3 = vpop.f32.mrb[60].mxu0  ;;  %v3057_v37 = vpop.f32.mrb[64].mxu1  ;;  %3245 = vmatmul.mubr.msk.f32.gmra.mrb[66].mxu0 %vm1885_vm3, %v1871_v63 }
 0x31b   : > { %v3002_v6 = vpop.f32.mrb[61].mxu0  ;;  %v3058_v34 = vpop.f32.mrb[65].mxu1  ;;  %3494 = vmatprep.subr.bf16.mxu1 %v3493_v50 }
 0x31c   : > { %v1872_v35 = vmax.f32 %v1856_v52, %v1864_v2  ;;  %v3003_v4 = vadd.f32 %v3002_v6, %v3001_v3  ;;  %v3059_v5 = vadd.f32 %v3058_v34, %v3057_v37  ;;  %3496 = vmatpush3.bf16.msra.mxu1 %v3493_v50  ;;  %v2509_v50 = vld [vmem:[%s4358_s17 + $0x8] sm:$0xff] }
 0x31e   : > { %v1865_v7 = vmax.f32 %v3003_v4, %v3059_v5  ;;  %3247 = vmatprep.mubr.msk.f32.mxu0 %vm1885_vm3, %v1872_v35  ;;  %v2170_v35 = vld [vmem:[%s4354_s13 + $0x8] sm:$0xff]  ;;  %v2336_v5 = vld [vmem:[%s4356_s15] sm:$0xff] }
 0x31f   : > { %v2254_v4 = vld [vmem:[%s4355_s14 + $0x8] sm:$0xff] }
 0x320   : > { %v1873_v42 = vmax.f32 %v1857_v62, %v1865_v7  ;;  %v2419_v7 = vld [vmem:[%s4357_s16] sm:$0xff] }
 0x322   : > { %3248 = vmatmul.mubr.msk.f32.gmra.mrb[68].mxu0 %vm1885_vm3, %v1873_v42  ;;  %v2337_v42 = vld [vmem:[%s4356_s15 + $0x8] sm:$0xff] }
 0x323   : > { %3282 = vmatprep.mubr.msk.f32.mxu0 %vm2171_vm4, %v2169_v30 }
 0x3dd   : > { %v3240_v52 = vpop.f32.mrb[62].mxu0 }
 0x3de   : > { %v1982_v60 = vadd.f32 %v3240_v52, %v2736_v51  ;;  %v1976_v61 = vpop.f32.mrb[63].mxu0  ;;  %v2510_v52 = vld [vmem:[%s4358_s17 + $0x10] sm:$0xff] }
 0x3df   : > { %v1977_v62 = vadd.f32 %v2736_v51, %v1976_v61 }
 0x3e0   : > { %v2016_v8 = vmax.f32 %v1982_v60, 0.0  ;;  %v2511_v60 = vld [vmem:[%s4358_s17 + $0x18] sm:$0xff] }
 0x3e1   : > { %v2015_v55 = vmax.f32 %v1977_v62, 0.0  ;;  %v3565_v61 = vpack.c.bf16 %v2511_v60, %v2510_v52 }
 0x3e3   : > { %3254 = vmatprep.mubr.msk.f32.mxu1 %vm1012_vm2, %v2015_v55 }
 0x3e4   : > { %3255 = vmatmul.mubr.msk.f32.vlgmr.msra.gmra.mrb[66].mxu1 %vm1012_vm2, %v2016_v8 }
 0x3e5   : > { %v3243_v18 = vpop.f32.mrb[64].mxu0 }
 0x3e6   : > { %v1992_v9 = vadd.f32 %v3243_v18, %v2736_v51  ;;  %v1986_v54 = vpop.f32.mrb[65].mxu0 }
 0x3e7   : > { %v1987_v10 = vadd.f32 %v2736_v51, %v1986_v54 }
 0x3e8   : > { %v2018_v12 = vmax.f32 %v1992_v9, 0.0 }
 0x3e9   : > { %v2017_v11 = vmax.f32 %v1987_v10, 0.0 }
 0x3eb   : > { %3257 = vmatprep.mubr.msk.f32.mxu1 %vm1012_vm2, %v2017_v11 }
 0x3ec   : > { %3258 = vmatmul.mubr.msk.f32.gmra.mrb[68].mxu1 %vm1012_vm2, %v2018_v12 }
 0x3ed   : > { %v3246_v13 = vpop.f32.mrb[66].mxu0 }
 0x3ee   : > { %v2002_v32 = vadd.f32 %v3246_v13, %v2736_v51  ;;  %v1996_v40 = vpop.f32.mrb[67].mxu0 }
 0x3ef   : > { %v1997_v17 = vadd.f32 %v2736_v51, %v1996_v40 }
 0x3f0   : > { %v2020_v20 = vmax.f32 %v2002_v32, 0.0 }
 0x3f1   : > { %v2019_v19 = vmax.f32 %v1997_v17, 0.0 }
 0x3f3   : > { %3260 = vmatprep.mubr.msk.f32.mxu1 %vm1012_vm2, %v2019_v19 }
 0x3f4   : > { %3261 = vmatmul.mubr.msk.f32.gmra.mrb[70].mxu1 %vm1012_vm2, %v2020_v20  ;;  %v2762_v20 = vld [vmem:[#allocation2] ss:$0 sm:$0xff] }
 0x3f5   : > { %v3249_v23 = vpop.f32.mrb[68].mxu0 }
 0x3f6   : > { %v2012_v56 = vadd.f32 %v3249_v23, %v2736_v51  ;;  %v2006_v24 = vpop.f32.mrb[69].mxu0 }
 0x3f7   : > { %v2007_v25 = vadd.f32 %v2736_v51, %v2006_v24  ;;  %v3561_v51 = vpack.c.bf16 %v2509_v50, %v2508_v44 }
 0x3f8   : > { %v2022_v29 = vmax.f32 %v2012_v56, 0.0 }
 0x3f9   : > { %v2021_v26 = vmax.f32 %v2007_v25, 0.0 }
 0x3fb   : > { %3263 = vmatprep.mubr.msk.f32.mxu1 %vm1012_vm2, %v2021_v26 }
 0x3fc   : > { %3264 = vmatmul.mubr.msk.f32.gmra.mrb[72].mxu1 %vm1012_vm2, %v2022_v29 }
 0x3fd   : > { %3301 = vmatprep.mubr.msk.f32.mxu1 %vm2171_vm4, %v2253_v31 }
 0x4b7   : > { %v3256_v36 = vpop.f32.mrb[66].mxu1 }
 0x4b8   : > { %v2128_v38 = vadd.f32 %v3256_v36, %v2745_v33  ;;  %v2122_v14 = vpop.f32.mrb[67].mxu1 }
 0x4b9   : > { %v2123_v15 = vadd.f32 %v2745_v33, %v2122_v14 }
 0x4ba   : > { %v2162_v16 = vmax.f32 %v2128_v38, 0.0 }
 0x4bb   : > { %v2161_v39 = vmax.f32 %v2123_v15, 0.0 }
 0x4bd   : > { %v3497_v41 = vpack.c.bf16 %v2162_v16, %v2161_v39 }
 0x4bf   : > { %v3259_v45 = vpop.f32.mrb[68].mxu1  ;;  %3498 = vmatprep.subr.bf16.mxu0 %v3497_v41  ;;  %3514 = vmatprep.subr.bf16.mxu1 %v3497_v41 }
 0x4c0   : > { %v2138_v46 = vadd.f32 %v3259_v45, %v2745_v33  ;;  %v2132_v48 = vpop.f32.mrb[69].mxu1  ;;  %3500 = vmatpush3.bf16.msra.mxu0 %v3497_v41  ;;  %3516 = vmatpush3.bf16.msra.mxu1 %v3497_v41 }
 0x4c1   : > { %v2133_v47 = vadd.f32 %v2745_v33, %v2132_v48 }
 0x4c2   : > { %v2164_v21 = vmax.f32 %v2138_v46, 0.0 }
 0x4c3   : > { %v2163_v22 = vmax.f32 %v2133_v47, 0.0 }
 0x4c5   : > { %v3501_v49 = vpack.c.bf16 %v2164_v21, %v2163_v22 }
 0x4c7   : > { %v3262_v53 = vpop.f32.mrb[70].mxu1  ;;  %3502 = vmatprep.subr.bf16.mxu0 %v3501_v49  ;;  %3518 = vmatprep.subr.bf16.mxu1 %v3501_v49 }
 0x4c8   : > { %v2148_v57 = vadd.f32 %v3262_v53, %v2745_v33  ;;  %v2142_v58 = vpop.f32.mrb[71].mxu1  ;;  %3504 = vmatpush3.bf16.msra.mxu0 %v3501_v49  ;;  %3520 = vmatpush3.bf16.msra.mxu1 %v3501_v49 }
 0x4c9   : > { %v2143_v59 = vadd.f32 %v2745_v33, %v2142_v58 }
 0x4ca   : > { %v2166_v27 = vmax.f32 %v2148_v57, 0.0 }
 0x4cb   : > { %v2165_v28 = vmax.f32 %v2143_v59, 0.0 }
 0x4cd   : > { %v3505_v63 = vpack.c.bf16 %v2166_v27, %v2165_v28 }
 0x4cf   : > { %v3265_v0 = vpop.f32.mrb[72].mxu1  ;;  %3506 = vmatprep.subr.bf16.mxu0 %v3505_v63  ;;  %3522 = vmatprep.subr.bf16.mxu1 %v3505_v63 }
 0x4d0   : > { %v2158_v1 = vadd.f32 %v3265_v0, %v2745_v33  ;;  %v2152_v2 = vpop.f32.mrb[73].mxu1  ;;  %3508 = vmatpush3.bf16.msra.mxu0 %v3505_v63  ;;  %3524 = vmatpush3.bf16.msra.mxu1 %v3505_v63 }
 0x4d1   : > { %v2153_v3 = vadd.f32 %v2745_v33, %v2152_v2 }
 0x4d2   : > { %v2168_v37 = vmax.f32 %v2158_v1, 0.0 }
 0x4d3   : > { %v2167_v6 = vmax.f32 %v2153_v3, 0.0 }
 0x4d5   : > { %v3509_v34 = vpack.c.bf16 %v2168_v37, %v2167_v6 }
 0x4d7   : > { %3510 = vmatprep.subr.bf16.mxu0 %v3509_v34  ;;  %3526 = vmatprep.subr.bf16.mxu1 %v3509_v34 }
 0x4d8   : > { %3512 = vmatpush3.bf16.msra.mxu0 %v3509_v34  ;;  %3528 = vmatpush3.bf16.msra.mxu1 %v3509_v34 }
 0x4d9   : > { %3530 = vmatprep.subr.bf16.mxu0 %v3497_v41  ;;  %3546 = vmatprep.subr.bf16.mxu1 %v3497_v41 }
 0x4db   : > { %3283 = vmatmul.mubr.msk.f32.vlgmr.msra.gmra.mrb[70].mxu0 %vm2171_vm4, %v2170_v35  ;;  %3302 = vmatmul.mubr.msk.f32.vlgmr.msra.gmra.mrb[74].mxu1 %vm2171_vm4, %v2254_v4 }
 0x4dc   : > { %3532 = vmatpush3.bf16.msra.mxu0 %v3497_v41  ;;  %3548 = vmatpush3.bf16.msra.mxu1 %v3497_v41 }
 0x4dd   : > { %3534 = vmatprep.subr.bf16.mxu0 %v3501_v49  ;;  %3550 = vmatprep.subr.bf16.mxu1 %v3501_v49 }
 0x4de   : > { %3320 = vmatprep.mubr.msk.f32.mxu0 %vm2171_vm4, %v2336_v5  ;;  %3339 = vmatprep.mubr.msk.f32.mxu1 %vm2171_vm4, %v2419_v7 }
 0x4e0   : > { %3536 = vmatpush3.bf16.msra.mxu0 %v3501_v49  ;;  %3552 = vmatpush3.bf16.msra.mxu1 %v3501_v49 }
 0x4e1   : > { %3538 = vmatprep.subr.bf16.mxu0 %v3505_v63  ;;  %3554 = vmatprep.subr.bf16.mxu1 %v3505_v63 }
 0x4e4   : > { %3540 = vmatpush3.bf16.msra.mxu0 %v3505_v63  ;;  %3556 = vmatpush3.bf16.msra.mxu1 %v3505_v63 }
 0x4e5   : > { %3542 = vmatprep.subr.bf16.mxu0 %v3509_v34  ;;  %3558 = vmatprep.subr.bf16.mxu1 %v3509_v34 }
 0x4e8   : > { %3544 = vmatpush3.bf16.msra.mxu0 %v3509_v34  ;;  %3560 = vmatpush3.bf16.msra.mxu1 %v3509_v34 }
 0x4e9   : > { %3562 = vmatprep.subr.bf16.mxu0 %v3561_v51 }
 0x4eb   : > { %3321 = vmatmul.mubr.msk.f32.vlgmr.msra.gmra.mrb[72].mxu0 %vm2171_vm4, %v2337_v42  ;;  %3340 = vmatmul.mubr.msk.f32.vlgmr.msra.gmra.mrb[76].mxu1 %vm2171_vm4, %v2420_v43 }
 0x4ec   : > { %3564 = vmatpush3.bf16.msra.mxu0 %v3561_v51 }
 0x4ed   : > { %3566 = vmatprep.subr.bf16.mxu0 %v3565_v61 }
 0x4f0   : > { %3568 = vmatpush3.bf16.msra.mxu0 %v3565_v61 }
 0x5ae   : > { %v3284_v62 = vpop.f32.mrb[70].mxu0  ;;  %v3303_v55 = vpop.f32.mrb[74].mxu1 }
 0x5af   : > { %v2503_v8 = vmax.f32 %v3284_v62, %v3303_v55  ;;  %v2244_v18 = vpop.f32.mrb[71].mxu0  ;;  %v2327_v9 = vpop.f32.mrb[75].mxu1 }
 0x5b0   : > { %v2502_v54 = vmax.f32 %v2244_v18, %v2327_v9 }
 0x5be   : > { %v3322_v10 = vpop.f32.mrb[72].mxu0  ;;  %v3341_v11 = vpop.f32.mrb[76].mxu1 }
 0x5bf   : > { %v2505_v12 = vmax.f32 %v3322_v10, %v3341_v11  ;;  %v2410_v13 = vpop.f32.mrb[73].mxu0  ;;  %v2493_v32 = vpop.f32.mrb[77].mxu1 }
 0x5c0   : > { %v2504_v40 = vmax.f32 %v2410_v13, %v2493_v32 }
 0x5c1   : > { %v2507_v17 = vmax.f32 %v2503_v8, %v2505_v12 }
 0x5c2   : > { %v2506_v19 = vmax.f32 %v2502_v54, %v2504_v40 }
 0x5c4   : > { %3350 = vmatprep.mubr.msk.f32.mxu0 %vm1885_vm3, %v2506_v19 }
 0x5c5   : > { %3351 = vmatmul.mubr.msk.f32.vlgmr.msra.gmra.mrb[74].mxu0 %vm1885_vm3, %v2507_v17 }
 0x698   : > { %v3352_v23 = vpop.f32.mrb[74].mxu0 }
 0x699   : > { %v2597_v56 = vadd.f32 %v3352_v23, %v2762_v20  ;;  %v2591_v24 = vpop.f32.mrb[75].mxu0 }
 0x69a   : > { %v2592_v25 = vadd.f32 %v2762_v20, %v2591_v24 }
 0x69b   : > { %v2601_v26 = vmax.f32 %v2597_v56, 0.0 }
 0x69c   : > { %v2600_v29 = vmax.f32 %v2592_v25, 0.0 }
 0x69d   : > { %2604 = vst.msk [vmem:[%s604_s25 + $0x8] sm:$0xff] %vm2602_vm5, %v2601_v26 }
 0x69e   : > { %2603 = vst.msk [vmem:[%s604_s25] sm:$0xff] %vm2602_vm5, %v2600_v29 }
 0x69f PF: > { %s31_s20 = sadd.s32 1, %s3585_s20  }
 0x6a0   : > { %p28_p4 = scmp.ge.s32.totalorder %s31_s20, 4  }
 0x6a2   :  { %30 = sbr.rel (!%p28_p4) target bundleno = 5 (0x5), region = 126 }

</bundles_post_ra>
